<compile_context>
chip_gen: v5e
topology: v5e:2x2
jax: 0.10.0
libtpu: 0.0.40
codegen_flags: <defaults>
</compile_context>

<pallas_src>
import functools

import jax
import jax.numpy as jnp
from jax.experimental import pallas as pl
from jax.experimental.pallas import tpu as pltpu

_LANE = 128


def _round_up(a, b):
    return (a + b - 1) // b * b


@functools.lru_cache(maxsize=None)
def _chip_config():
    """Best-effort chip-generation detection (trace-time constant, never traced)."""
    try:
        kind = jax.devices()[0].device_kind.lower()
    except Exception:
        kind = ""
    if "v7" in kind or "7x" in kind:
        return "v7x"
    if "v6" in kind:
        return "v6e"
    if "v5" in kind and ("lite" in kind or "v5e" in kind):
        return "v5e"
    return "other"


def _probe_buffered_one():
    """One-time eager feature probe: does this build accept pipeline_mode=pl.Buffered(1)?"""
    if not hasattr(pl, "Buffered"):
        return False

    def _probe_kernel(x_ref, o_ref):
        o_ref[...] = x_ref[...] + 1.0

    try:
        fn = pl.pallas_call(
            _probe_kernel,
            out_shape=jax.ShapeDtypeStruct((8, 128), jnp.float32),
            grid=(2,),
            in_specs=[pl.BlockSpec((8, 128), lambda i: (0, 0),
                                   pipeline_mode=pl.Buffered(1))],
            out_specs=pl.BlockSpec((8, 128), lambda i: (0, 0)),
        )
        jax.block_until_ready(fn(jnp.zeros((8, 128), jnp.float32)))
        return True
    except Exception:  # narrow feature detection only; never on the hot path
        return False


# Import-time probe (eager, outside any jit trace) so feed_forward only reads a cached bool.
_BUFFERED1_OK = _probe_buffered_one()


def _make_ffn_kernel(n_hc, hc, bf16_epilogue):
    def kernel(x_ref, w1_ref, b1_ref, w2_ref, b2_ref, o_ref):
        # x_ref : (D, TM)  f32, tokens on lanes      -- streamed
        # w1_ref: (H, D)   bf16, torch (out,in)      -- resident
        # b1_ref: (H, 1)   bf16 (v6e/v7x) / f32 (v5e)-- resident
        # w2_ref: (D, H)   bf16, torch (out,in)      -- resident
        # b2_ref: (D, 1)   f32                       -- resident
        # o_ref : (D, TM)  f32, tokens on lanes
        x = x_ref[...].astype(jnp.bfloat16)          # single-pass HBM read, cheap in-kernel cast
        acc = None
        # Static unroll over hidden-dim chunks (n_hc is 2-4 here): bounds the live (hc, TM)
        # intermediate.  TODO(synk): switch to lax.fori_loop(unroll=True) if n_hc grows large.
        for c in range(n_hc):
            lo = c * hc
            w1c = w1_ref[pl.ds(lo, hc), :]           # (hc, D)
            b1c = b1_ref[pl.ds(lo, hc), :]           # (hc, 1)
            w2c = w2_ref[:, pl.ds(lo, hc)]           # (D, hc)
            # h_T = W1c @ x_T  (MXU-native: contract D, f32 accumulate)
            h = jnp.dot(w1c, x, preferred_element_type=jnp.float32)     # (hc, TM)
            if bf16_epilogue:
                # v6e/v7x: bf16 VPU -> bias + ReLU in bf16 (halves VALU + VMEM traffic on h)
                h = jnp.maximum(h.astype(jnp.bfloat16) + b1c, 0)
            else:
                # v5e: no bf16 VALU -> f32 epilogue, then cast for the second MXU pass
                h = jnp.maximum(h + b1c, 0.0).astype(jnp.bfloat16)
            # acc_T += W2c @ h_T  (MXU-native: contract hc)
            part = jnp.dot(w2c, h, preferred_element_type=jnp.float32)  # (D, TM)
            acc = part if acc is None else acc + part
        o_ref[...] = (acc + b2_ref[...]).astype(o_ref.dtype)
    return kernel


def _vmem_limit_bytes(D, H, tm, hc, x_itemsize, single_buffer_weights):
    io_tiles = 2 * (D * tm * x_itemsize) + 2 * (D * tm * 4)   # x/out tiles, double-buffered
    wbufs = 1 if single_buffer_weights else 2
    weights = wbufs * (2 * H * D * 2 + (H + D) * 4)           # w1+w2 bf16, biases
    h_live = hc * tm * (4 + 2)                                # f32 MXU result + bf16 activation
    acc = D * tm * 4
    need = io_tiles + weights + h_live + acc
    return int(min(max(2 * need, 16 << 20), 48 << 20))


def _ffn_pallas(xT, w1_b, b1_c, w2_b, b2_c, *, tm, hc, n_hc, bf16_epilogue,
                single_buffer_weights, core_parallel):
    D, Mp = xT.shape
    H = w1_b.shape[0]
    grid = Mp // tm

    # Constant-index (resident) blocks don't need double buffering; use Buffered(1) only when
    # the import-time probe confirmed support.
    const_kw = {"pipeline_mode": pl.Buffered(1)} if single_buffer_weights else {}

    if core_parallel and grid >= 2 and hasattr(pltpu, "CORE_PARALLEL"):
        dim_sem = (pltpu.CORE_PARALLEL,)      # shard the M axis across both v7x TensorCores
    else:
        dim_sem = ("parallel",)

    return pl.pallas_call(
        _make_ffn_kernel(n_hc, hc, bf16_epilogue),
        out_shape=jax.ShapeDtypeStruct((D, Mp), xT.dtype),
        grid_spec=pltpu.PrefetchScalarGridSpec(
            num_scalar_prefetch=0,
            grid=(grid,),
            in_specs=[
                pl.BlockSpec((D, tm), lambda i: (0, i)),             # x tile (lane-dense)
                pl.BlockSpec((H, D), lambda i: (0, 0), **const_kw),  # W1 (resident)
                pl.BlockSpec((H, 1), lambda i: (0, 0), **const_kw),  # b1
                pl.BlockSpec((D, H), lambda i: (0, 0), **const_kw),  # W2 (resident)
                pl.BlockSpec((D, 1), lambda i: (0, 0), **const_kw),  # b2
            ],
            out_specs=pl.BlockSpec((D, tm), lambda i: (0, i)),       # out tile (lane-dense)
        ),
        compiler_params=pltpu.CompilerParams(
            dimension_semantics=dim_sem,
            vmem_limit_bytes=_vmem_limit_bytes(D, H, tm, hc, xT.dtype.itemsize,
                                               single_buffer_weights),
        ),
    )(xT, w1_b, b1_c, w2_b, b2_c)


def feed_forward(x, w1, b1, w2, b2, *, tm=2048):
    """x: (B, T, D).  w1: (H, D), b1: (H,), w2: (D, H), b2: (D,)  (torch Linear layout)."""
    B, T, D = x.shape
    H = w1.shape[0]
    M = B * T

    gen = _chip_config()
    bf16_epilogue = gen in ("v6e", "v7x")
    hc_cap = 256 if gen == "v5e" else 512     # bound the h spill on 1-vst-slot v5e

    # Token tile lives on the LANE dim now -> multiple of 128, capped by the token count.
    tm_eff = min(_round_up(max(tm, _LANE), _LANE), _round_up(M, _LANE))
    # Only 2-TensorCore chips (v7x) benefit from splitting into >=2 grid steps; on single-TC
    # chips the grid is a serial loop and halving the tile is pure per-step overhead.
    if gen == "v7x" and _round_up(M, tm_eff) // tm_eff < 2 and tm_eff >= 2 * _LANE:
        tm_eff = _round_up(tm_eff // 2, _LANE)
    Mp = _round_up(M, tm_eff)

    # Hidden-dim chunk width (multiples of 128 keep the MXU aligned).
    hc = hc_cap
    while hc > 128 and H % hc:
        hc //= 2
    if H % hc:
        hc = H
    n_hc = H // hc

    # Tokens-on-lanes layout: one XLA transpose in, one out.
    xT = x.reshape(M, D).T                     # (D, M)
    if Mp != M:
        xT = jnp.pad(xT, ((0, 0), (0, Mp - M)))

    # Weights stay in torch (out,in) layout; casts are constant-folded/cached under jit and are
    # no-ops if the caller already stores bf16 params.
    w1_b = w1.astype(jnp.bfloat16)
    w2_b = w2.astype(jnp.bfloat16)
    b1_c = b1.reshape(H, 1).astype(jnp.bfloat16 if bf16_epilogue else jnp.float32)
    b2_c = b2.reshape(D, 1).astype(jnp.float32)

    out_T = _ffn_pallas(xT, w1_b, b1_c, w2_b, b2_c,
                        tm=tm_eff, hc=hc, n_hc=n_hc,
                        bf16_epilogue=bf16_epilogue,
                        single_buffer_weights=_BUFFERED1_OK,
                        core_parallel=(gen == "v7x"))

    return out_T[:, :M].T.reshape(B, T, D)


if __name__ == "__main__":
    # Small shapes consistent with the module: n_embd=32, hidden = 32*n_embd = 1024.
    B, T, n_embd = 2, 8, 32
    hidden = 32 * n_embd

    key = jax.random.PRNGKey(0)
    kx, k1, k2, k3, k4 = jax.random.split(key, 5)

    x = jax.random.normal(kx, (B, T, n_embd), dtype=jnp.float32)
    # torch Linear layout: weight (out, in), bias (out,)
    w1 = jax.random.normal(k1, (hidden, n_embd), dtype=jnp.float32) * 0.02
    b1 = jax.random.normal(k2, (hidden,), dtype=jnp.float32) * 0.02
    w2 = jax.random.normal(k3, (n_embd, hidden), dtype=jnp.float32) * 0.02
    b2 = jax.random.normal(k4, (n_embd,), dtype=jnp.float32) * 0.02

    ffn = jax.jit(feed_forward, static_argnames=("tm",))
    y = jax.block_until_ready(ffn(x, w1, b1, w2, b2))
    assert y.shape == (B, T, n_embd)

    # Reference matched to the kernel's numerics (bf16 MXU inputs, f32 accumulation, epilogue
    # precision chosen per detected chip generation).
    bf16_epi = _chip_config() in ("v6e", "v7x")
    xb = x.astype(jnp.bfloat16)
    w1b = w1.astype(jnp.bfloat16)
    w2b = w2.astype(jnp.bfloat16)
    h32 = jnp.einsum("btd,hd->bth", xb, w1b, preferred_element_type=jnp.float32)
    if bf16_epi:
        hb = jnp.maximum(h32.astype(jnp.bfloat16) + b1.astype(jnp.bfloat16), 0)
    else:
        hb = jnp.maximum(h32 + b1, 0.0).astype(jnp.bfloat16)
    y_ref = jnp.einsum("bth,dh->btd", hb, w2b, preferred_element_type=jnp.float32) + b2
    assert jnp.allclose(y, y_ref, atol=2e-3, rtol=2e-3), "mismatch vs bf16-matched reference"

    # Sanity check vs. pure f32 reference with bf16-appropriate tolerance.
    h32f = jnp.maximum(jnp.einsum("btd,hd->bth", x, w1) + b1, 0.0)
    y32 = jnp.einsum("bth,dh->btd", h32f, w2) + b2
    assert jnp.allclose(y, y32, atol=5e-2, rtol=5e-2), "mismatch vs f32 reference"

    print("KERNEL_OK")
</pallas_src>

<mosaic_0001>
module attributes {stable_mosaic.version = 11 : i64} {
  func.func @_probe_kernel(%arg0: i32, %arg1: memref<8x128xf32, #tpu.memory_space<vmem>>, %arg2: memref<8x128xf32, #tpu.memory_space<vmem>>) attributes {dimension_semantics = [#tpu.dimension_semantics<arbitrary>], iteration_bounds = array<i64: 2>, scalar_prefetch = 0 : i64, scratch_operands = 0 : i64, tpu.core_type = #tpu.core_type<tc>, window_params = [{pipeline_mode = #tpu.pipeline_mode<synchronous>, transform_indices = @transform_0, window_bounds = array<i64: 8, 128>}, {pipeline_mode = #tpu.pipeline_mode<synchronous>, transform_indices = @transform_1, window_bounds = array<i64: 8, 128>}]} {
    %c0 = arith.constant 0 : index
    %c0_0 = arith.constant 0 : index
    %0 = vector.load %arg1[%c0, %c0_0] : memref<8x128xf32, #tpu.memory_space<vmem>>, vector<8x128xf32>
    %cst = arith.constant 1.000000e+00 : f32
    %1 = vector.broadcast %cst : f32 to vector<8x128xf32>
    %2 = arith.addf %0, %1 : vector<8x128xf32>
    %c0_1 = arith.constant 0 : index
    %c0_2 = arith.constant 0 : index
    %3 = vector.load %arg2[%c0_1, %c0_2] : memref<8x128xf32, #tpu.memory_space<vmem>>, vector<8x128xf32>
    tpu.vector_store %arg2[%c0_1, %c0_2], %2 {strides = array<i32>} : memref<8x128xf32, #tpu.memory_space<vmem>>, vector<8x128xf32>,
    return
  }
  func.func @transform_0(%arg0: i32) -> (i32, i32) {
    %c0_i32 = arith.constant 0 : i32
    %c0_i32_0 = arith.constant 0 : i32
    %c0_i32_1 = arith.constant 0 : i32
    return %c0_i32, %c0_i32_0 : i32, i32
  }
  func.func @transform_1(%arg0: i32) -> (i32, i32) {
    %c0_i32 = arith.constant 0 : i32
    %c0_i32_0 = arith.constant 0 : i32
    %c0_i32_1 = arith.constant 0 : i32
    return %c0_i32, %c0_i32_0 : i32, i32
  }
}

module attributes {stable_mosaic.version = 11 : i64} {
  func.func @kernel(%arg0: i32, %arg1: memref<32x128xf32, #tpu.memory_space<vmem>>, %arg2: memref<1024x32xbf16, #tpu.memory_space<vmem>>, %arg3: memref<1024x1xf32, #tpu.memory_space<vmem>>, %arg4: memref<32x1024xbf16, #tpu.memory_space<vmem>>, %arg5: memref<32x1xf32, #tpu.memory_space<vmem>>, %arg6: memref<32x128xf32, #tpu.memory_space<vmem>>) attributes {dimension_semantics = [#tpu.dimension_semantics<parallel>], iteration_bounds = array<i64: 1>, scalar_prefetch = 0 : i64, scratch_operands = 0 : i64, tpu.core_type = #tpu.core_type<tc>, window_params = [{transform_indices = @transform_0, window_bounds = array<i64: 32, 128>}, {pipeline_mode = #tpu.pipeline_mode<synchronous>, transform_indices = @transform_1, window_bounds = array<i64: 1024, 32>}, {pipeline_mode = #tpu.pipeline_mode<synchronous>, transform_indices = @transform_2, window_bounds = array<i64: 1024, 1>}, {pipeline_mode = #tpu.pipeline_mode<synchronous>, transform_indices = @transform_3, window_bounds = array<i64: 32, 1024>}, {pipeline_mode = #tpu.pipeline_mode<synchronous>, transform_indices = @transform_4, window_bounds = array<i64: 32, 1>}, {transform_indices = @transform_5, window_bounds = array<i64: 32, 128>}]} {
    %c0 = arith.constant 0 : index
    %c0_0 = arith.constant 0 : index
    %0 = vector.load %arg1[%c0, %c0_0] : memref<32x128xf32, #tpu.memory_space<vmem>>, vector<32x128xf32>
    %1 = arith.truncf %0 : vector<32x128xf32> to vector<32x128xbf16>
    %c0_1 = arith.constant 0 : index
    %c0_2 = arith.constant 0 : index
    %2 = vector.load %arg2[%c0_1, %c0_2] : memref<1024x32xbf16, #tpu.memory_space<vmem>>, vector<512x32xbf16>
    %c0_3 = arith.constant 0 : index
    %c0_4 = arith.constant 0 : index
    %3 = vector.load %arg3[%c0_3, %c0_4] : memref<1024x1xf32, #tpu.memory_space<vmem>>, vector<512x1xf32>
    %c0_5 = arith.constant 0 : index
    %c0_6 = arith.constant 0 : index
    %4 = vector.load %arg4[%c0_5, %c0_6] : memref<32x1024xbf16, #tpu.memory_space<vmem>>, vector<32x512xbf16>
    %cst = arith.constant dense<0.000000e+00> : vector<512x128xf32>
    %5 = tpu.matmul %2, %1, %cst {dimension_numbers = #tpu.dot_dimension_numbers<[1], [0], [0], [1], [0, 0, 1, 1], [], []>} : vector<512x32xbf16>, vector<32x128xbf16>, vector<512x128xf32> -> vector<512x128xf32>
    %6 = vector.broadcast %3 : vector<512x1xf32> to vector<512x128xf32>
    %7 = arith.addf %5, %6 : vector<512x128xf32>
    %cst_7 = arith.constant 0.000000e+00 : f32
    %8 = vector.broadcast %cst_7 : f32 to vector<512x128xf32>
    %9 = arith.maximumf %7, %8 : vector<512x128xf32>
    %10 = arith.truncf %9 : vector<512x128xf32> to vector<512x128xbf16>
    %cst_8 = arith.constant dense<0.000000e+00> : vector<32x128xf32>
    %11 = tpu.matmul %4, %10, %cst_8 {dimension_numbers = #tpu.dot_dimension_numbers<[1], [0], [0], [1], [0, 0, 1, 1], [], []>} : vector<32x512xbf16>, vector<512x128xbf16>, vector<32x128xf32> -> vector<32x128xf32>
    %c512 = arith.constant 512 : index
    %c0_9 = arith.constant 0 : index
    %12 = vector.load %arg2[%c512, %c0_9] : memref<1024x32xbf16, #tpu.memory_space<vmem>>, vector<512x32xbf16>
    %c512_10 = arith.constant 512 : index
    %c0_11 = arith.constant 0 : index
    %13 = vector.load %arg3[%c512_10, %c0_11] : memref<1024x1xf32, #tpu.memory_space<vmem>>, vector<512x1xf32>
    %c0_12 = arith.constant 0 : index
    %c512_13 = arith.constant 512 : index
    %14 = vector.load %arg4[%c0_12, %c512_13] : memref<32x1024xbf16, #tpu.memory_space<vmem>>, vector<32x512xbf16>
    %cst_14 = arith.constant dense<0.000000e+00> : vector<512x128xf32>
    %15 = tpu.matmul %12, %1, %cst_14 {dimension_numbers = #tpu.dot_dimension_numbers<[1], [0], [0], [1], [0, 0, 1, 1], [], []>} : vector<512x32xbf16>, vector<32x128xbf16>, vector<512x128xf32> -> vector<512x128xf32>
    %16 = vector.broadcast %13 : vector<512x1xf32> to vector<512x128xf32>
    %17 = arith.addf %15, %16 : vector<512x128xf32>
    %cst_15 = arith.constant 0.000000e+00 : f32
    %18 = vector.broadcast %cst_15 : f32 to vector<512x128xf32>
    %19 = arith.maximumf %17, %18 : vector<512x128xf32>
    %20 = arith.truncf %19 : vector<512x128xf32> to vector<512x128xbf16>
    %cst_16 = arith.constant dense<0.000000e+00> : vector<32x128xf32>
    %21 = tpu.matmul %14, %20, %cst_16 {dimension_numbers = #tpu.dot_dimension_numbers<[1], [0], [0], [1], [0, 0, 1, 1], [], []>} : vector<32x512xbf16>, vector<512x128xbf16>, vector<32x128xf32> -> vector<32x128xf32>
    %22 = arith.addf %11, %21 : vector<32x128xf32>
    %c0_17 = arith.constant 0 : index
    %c0_18 = arith.constant 0 : index
    %23 = vector.load %arg5[%c0_17, %c0_18] : memref<32x1xf32, #tpu.memory_space<vmem>>, vector<32x1xf32>
    %24 = vector.broadcast %23 : vector<32x1xf32> to vector<32x128xf32>
    %25 = arith.addf %22, %24 : vector<32x128xf32>
    %c0_19 = arith.constant 0 : index
    %c0_20 = arith.constant 0 : index
    %26 = vector.load %arg6[%c0_19, %c0_20] : memref<32x128xf32, #tpu.memory_space<vmem>>, vector<32x128xf32>
    tpu.vector_store %arg6[%c0_19, %c0_20], %25 {strides = array<i32>} : memref<32x128xf32, #tpu.memory_space<vmem>>, vector<32x128xf32>,
    return
  }
  func.func @transform_0(%arg0: i32) -> (i32, i32) {
    %c0_i32 = arith.constant 0 : i32
    %c0_i32_0 = arith.constant 0 : i32
    return %c0_i32, %arg0 : i32, i32
  }
  func.func @transform_1(%arg0: i32) -> (i32, i32) {
    %c0_i32 = arith.constant 0 : i32
    %c0_i32_0 = arith.constant 0 : i32
    %c0_i32_1 = arith.constant 0 : i32
    return %c0_i32, %c0_i32_0 : i32, i32
  }
  func.func @transform_2(%arg0: i32) -> (i32, i32) {
    %c0_i32 = arith.constant 0 : i32
    %c0_i32_0 = arith.constant 0 : i32
    %c0_i32_1 = arith.constant 0 : i32
    return %c0_i32, %c0_i32_0 : i32, i32
  }
  func.func @transform_3(%arg0: i32) -> (i32, i32) {
    %c0_i32 = arith.constant 0 : i32
    %c0_i32_0 = arith.constant 0 : i32
    %c0_i32_1 = arith.constant 0 : i32
    return %c0_i32, %c0_i32_0 : i32, i32
  }
  func.func @transform_4(%arg0: i32) -> (i32, i32) {
    %c0_i32 = arith.constant 0 : i32
    %c0_i32_0 = arith.constant 0 : i32
    %c0_i32_1 = arith.constant 0 : i32
    return %c0_i32, %c0_i32_0 : i32, i32
  }
  func.func @transform_5(%arg0: i32) -> (i32, i32) {
    %c0_i32 = arith.constant 0 : i32
    %c0_i32_0 = arith.constant 0 : i32
    return %c0_i32, %arg0 : i32, i32
  }
}

</mosaic_0001>

<bundles_post_ra>
// kernel: tpu_custom_call.1
= control target key start
LH: loop header
LB: loop body
LE: loop exit
PB: predicated region body
PF: predicated region fallthrough
CT: control target
= control target key end

     0   :  { %6 = vsyncpa [#allocation3], 0  ;;  %s287_s0 = inlined_call_operand.hbm [shape: f32[8,128], index: 0, kind: input, shape index: {}]   ;;  %s288_s1 = inlined_call_operand.hbm [shape: f32[8,128], index: 1, kind: output, shape index: {}]  }
   0x1   :  { %7 = vsyncpa [#allocation4], 0  ;;  %s270_s6 = smov 0  }
   0x2 LB: > { %s149_s7 = sadd.s32 4294967295, %s256_s6   ;;  %p150_p0 = scmp.ge.s32.totalorder %s256_s6, 1  ;;  %s256_s6 = sphi %s270_s6, %s13_s6  }
   0x3   : > { %p60_p1 = scmp.lt.s32.totalorder %s256_s6, 3  ;;  %s72_s10 = sshll.u32 %s287_s0, 4  ;;  %s73_s10 = int_to_ptr.hbm [resolvable:$true] %s72_s10 }
   0x4   : > { %p170_p3 = scmp.eq.s32.totalorder %s149_s7, 0  ;;  %s258_s11 = smov [#allocation2]  }
   0x5   : > { %p61_p2 = pnand %p150_p0, %p60_p1  ;;  %s74_s12 = sshll.u32 %s258_s11, 4  ;;  %s75_s12 = int_to_ptr.vmem [resolvable:$true] %s74_s12 }
   0x7   : > { %p166_p4 = pneg %p61_p2  ;;  %87 = sbr.rel (%p61_p2) target bundleno = 20 (0x14), region = 24 }
   0x9   : > { %p167_p5 = pnand %p170_p3, %p166_p4 }
   0xb   : > { %169 = dma.hbm_to_vmem [thread:$0]  (!%p167_p5), %s73_s10, 128, %s75_s12, [#allocation3]  }
   0xc   : > { %247 = dma.done.wait (%p170_p3), [#allocation3], 128  }
   0xd   : > { %249 = vsyncadd (%p170_p3), [#allocation3], 4294967168  ;;  %s259_s13 = smov [#allocation5]   ;;  %s109_s17 = sshll.u32 %s288_s1, 4  ;;  %v98_v0 = vld [vmem:[#allocation2] sm:$0xff]  ;;  %s110_s17 = int_to_ptr.hbm [resolvable:$true] %s109_s17 }
   0xe   : > { %s107_s14 = sshll.u32 %s259_s13, 4  ;;  %p172_p6 = scmp.eq.s32.totalorder %s149_s7, 1  ;;  %v99_v1 = vadd.f32 1.0, %v98_v0  ;;  %s108_s14 = int_to_ptr.vmem [resolvable:$true] %s107_s14 }
  0x10   : > { %100 = vst [vmem:[#allocation5] sm:$0xff] %v99_v1 }
  0x11   : > { %163 = dma.vmem_to_hbm [thread:$0]  (%p172_p6), %s108_s14, 128, %s110_s17, [#allocation4]  }
  0x12   : > { %251 = dma.done.wait (%p172_p6), [#allocation4], 128  }
  0x13   : > { %253 = vsyncadd (%p172_p6), [#allocation4], 4294967168 }
  0x14 PF: > { %s13_s6 = sadd.s32 1, %s256_s6  }
  0x15   : > { %p10_p7 = scmp.ge.s32.totalorder %s13_s6, 4  }
  0x17   :  { %12 = sbr.rel (!%p10_p7) target bundleno = 2 (0x2), region = 53 }
  0x1c   :  { %123 = vsyncpa [#allocation3], 1 }
  0x1d   :  { %125 = vsyncpa [#allocation3 + $0x1], 1 }
  0x1e   :  { %126 = vsyncpa [#allocation4], 1 }
  0x1f   :  { %128 = vsyncpa [#allocation4 + $0x1], 1 }

// kernel: feed_forward.1
= control target key start
LH: loop header
LB: loop body
LE: loop exit
PB: predicated region body
PF: predicated region fallthrough
CT: control target
= control target key end

     0   :  { %v2722_v0 = vmov 0   ;;  %vm643_vm0 = vcmask 261120   ;;  %s4065_s2 = inlined_call_operand.vmem [shape: f32[1024,1], index: 2, kind: input, shape index: {}]   ;;  %s4066_s0 = inlined_call_operand.vmem [shape: f32[32,128], index: 0, kind: input, shape index: {}]   ;;  %s4067_s1 = inlined_call_operand.vmem [shape: bf16[1024,32], index: 1, kind: input, shape index: {}]   ;;  %s4068_s4 = inlined_call_operand.vmem [shape: f32[32,1], index: 4, kind: input, shape index: {}]   ;;  %s4069_s3 = inlined_call_operand.vmem [shape: bf16[32,1024], index: 3, kind: input, shape index: {}]   ;;  %s4070_s5 = inlined_call_operand.vmem [shape: f32[32,128], index: 5, kind: output, shape index: {}]  }
   0x1   :  { %2721 = vset.pattern.permute.xlu2 %v2722_v0  ;;  %2720 = vset.pattern.permute.xlu1 %v2722_v0  ;;  %v95_v1 = vld [vmem:[%s4065_s2 + $0x20] sm:$0xff]  ;;  %v93_v2 = vld [vmem:[%s4065_s2 + $0x10] sm:$0xff]  ;;  %v24_v5 = vld [vmem:[%s4066_s0 + $0x18] sm:$0xff] }
   0x2   :  { %v91_v3 = vld [vmem:[%s4065_s2] sm:$0xff]  ;;  %2719 = vset.pattern.permute.xlu0 %v2722_v0  ;;  %185 = vperm.xlu2 %2721, %v95_v1   ;;  %v23_v4 = vld [vmem:[%s4066_s0 + $0x10] sm:$0xff]  ;;  %v22_v8 = vld [vmem:[%s4066_s0 + $0x8] sm:$0xff] }
   0x3   :  { %v21_v6 = vld [vmem:[%s4066_s0] sm:$0xff]  ;;  %175 = vperm.xlu1 %2720, %v93_v2   ;;  %165 = vperm.xlu0 %2719, %v91_v3   ;;  %v26_v7 = vpack.c.bf16 %v24_v5, %v23_v4  ;;  %v96_v10 = vld [vmem:[%s4065_s2 + $0x28] sm:$0xff]  ;;  %v94_v11 = vld [vmem:[%s4065_s2 + $0x18] sm:$0xff] }
   0x4   :  { %v25_v9 = vpack.c.bf16 %v22_v8, %v21_v6  ;;  %v92_v12 = vld [vmem:[%s4065_s2 + $0x8] sm:$0xff]  ;;  %v2634_v13 = vld [vmem:[%s4067_s1] sm:$0xff]  ;;  %v98_v18 = vld [vmem:[%s4065_s2 + $0x38] sm:$0xff] }
   0x5   :  { %746 = vmatpush.bf16.msra.mxu0 %v26_v7  ;;  %2714 = vmatpush.bf16.msra.mxu2 %v26_v7  ;;  %v2655_v14 = vld [vmem:[%s4067_s1 + $0xa8] sm:$0xff]  ;;  %v2674_v15 = vld [vmem:[%s4067_s1 + $0x100] sm:$0xff]  ;;  %v97_v19 = vld [vmem:[%s4065_s2 + $0x30] sm:$0xff] }
   0x6   :  { %1723 = vmatpush.bf16.msra.mxu1 %v26_v7  ;;  %2716 = vmatpush.bf16.msra.mxu3 %v26_v7  ;;  %v2694_v16 = vld [vmem:[%s4067_s1 + $0x1a0] sm:$0xff]  ;;  %v102_v20 = vld [vmem:[%s4065_s2 + $0x58] sm:$0xff]  ;;  %v101_v21 = vld [vmem:[%s4065_s2 + $0x50] sm:$0xff] }
   0x7   :  { %v99_v17 = vld [vmem:[%s4065_s2 + $0x40] sm:$0xff]  ;;  %v100_v22 = vld [vmem:[%s4065_s2 + $0x48] sm:$0xff]  ;;  %v2656_v24 = vld [vmem:[%s4067_s1 + $0xb0] sm:$0xff] }
   0x8   :  { %v2635_v23 = vld [vmem:[%s4067_s1 + $0x8] sm:$0xff]  ;;  %v105_v27 = vld [vmem:[%s4065_s2 + $0x70] sm:$0xff]  ;;  %v103_v29 = vld [vmem:[%s4065_s2 + $0x60] sm:$0xff] }
   0x9   :  { %747 = vmatpush.bf16.msra.mxu0 %v25_v9  ;;  %2715 = vmatpush.bf16.msra.mxu2 %v25_v9  ;;  %v2675_v25 = vld [vmem:[%s4067_s1 + $0x108] sm:$0xff]  ;;  %v107_v31 = vld [vmem:[%s4065_s2 + $0x80] sm:$0xff]  ;;  %v106_v32 = vld [vmem:[%s4065_s2 + $0x78] sm:$0xff] }
   0xa   :  { %1724 = vmatpush.bf16.msra.mxu1 %v25_v9  ;;  %190 = vperm.xlu2 %2721, %v96_v10   ;;  %v2695_v26 = vld [vmem:[%s4067_s1 + $0x1a8] sm:$0xff]  ;;  %v2636_v33 = vld [vmem:[%s4067_s1 + $0x10] sm:$0xff]  ;;  %v2657_v34 = vld [vmem:[%s4067_s1 + $0xb8] sm:$0xff] }
   0xb   :  { %180 = vperm.xlu1 %2720, %v94_v11   ;;  %170 = vperm.xlu0 %2719, %v92_v12   ;;  %v104_v28 = vld [vmem:[%s4065_s2 + $0x68] sm:$0xff]  ;;  %v2676_v35 = vld [vmem:[%s4067_s1 + $0x110] sm:$0xff]  ;;  %v111_v37 = vld [vmem:[%s4065_s2 + $0xa0] sm:$0xff] }
   0xc   :  { %2378 = vmatmul.msk.bf16.vlgmr.msra.gmra.mxu0 %vm643_vm0, %v2634_v13  ;;  %2399 = vmatmul.msk.bf16.vlgmr.msra.gmra.mxu2 %vm643_vm0, %v2655_v14  ;;  %v108_v30 = vld [vmem:[%s4065_s2 + $0x88] sm:$0xff]  ;;  %v2696_v36 = vld [vmem:[%s4067_s1 + $0x1b0] sm:$0xff]  ;;  %v110_v38 = vld [vmem:[%s4065_s2 + $0x98] sm:$0xff] }
   0xd   :  { %2538 = vmatmul.msk.bf16.vlgmr.msra.gmra.mxu1 %vm643_vm0, %v2674_v15  ;;  %2717 = vmatpush.bf16.msra.mxu3 %v25_v9  ;;  %v109_v39 = vld [vmem:[%s4065_s2 + $0x90] sm:$0xff]  ;;  %v114_v40 = vld [vmem:[%s4065_s2 + $0xb8] sm:$0xff]  ;;  %v112_v42 = vld [vmem:[%s4065_s2 + $0xa8] sm:$0xff] }
   0xe   :  { %v113_v41 = vld [vmem:[%s4065_s2 + $0xb0] sm:$0xff]  ;;  %v2637_v43 = vld [vmem:[%s4067_s1 + $0x18] sm:$0xff]  ;;  %v2658_v44 = vld [vmem:[%s4067_s1 + $0xc0] sm:$0xff] }
   0xf   :  { %v2677_v45 = vld [vmem:[%s4067_s1 + $0x118] sm:$0xff]  ;;  %v117_v47 = vld [vmem:[%s4065_s2 + $0xd0] sm:$0xff]  ;;  %v116_v48 = vld [vmem:[%s4065_s2 + $0xc8] sm:$0xff] }
  0x10   :  { %2558 = vmatmul.msk.bf16.vlgmr.msra.gmra.mxu3 %vm643_vm0, %v2694_v16  ;;  %v2697_v46 = vld [vmem:[%s4067_s1 + $0x1b8] sm:$0xff]  ;;  %v115_v49 = vld [vmem:[%s4065_s2 + $0xc0] sm:$0xff]  ;;  %v120_v50 = vld [vmem:[%s4065_s2 + $0xe8] sm:$0xff] }
  0x11   :  { %v119_v51 = vld [vmem:[%s4065_s2 + $0xe0] sm:$0xff]  ;;  %v118_v52 = vld [vmem:[%s4065_s2 + $0xd8] sm:$0xff]  ;;  %v2659_v54 = vld [vmem:[%s4067_s1 + $0xc8] sm:$0xff] }
  0x12   :  { %205 = vperm.xlu2 %2721, %v99_v17   ;;  %v2638_v53 = vld [vmem:[%s4067_s1 + $0x20] sm:$0xff]  ;;  %v122_v58 = vld [vmem:[%s4065_s2 + $0xf8] sm:$0xff]  ;;  %v121_v59 = vld [vmem:[%s4065_s2 + $0xf0] sm:$0xff] }
  0x13   :  { %200 = vperm.xlu1 %2720, %v98_v18   ;;  %195 = vperm.xlu0 %2719, %v97_v19   ;;  %v2678_v55 = vld [vmem:[%s4067_s1 + $0x120] sm:$0xff]  ;;  %v126_v60 = vld [vmem:[%s4065_s2 + $0x118] sm:$0xff]  ;;  %v125_v61 = vld [vmem:[%s4065_s2 + $0x110] sm:$0xff] }
  0x14   :  { %v2698_v56 = vld [vmem:[%s4067_s1 + $0x1c0] sm:$0xff]  ;;  %v124_v62 = vld [vmem:[%s4065_s2 + $0x108] sm:$0xff]  ;;  %v2660_v0 = vld [vmem:[%s4067_s1 + $0xd0] sm:$0xff] }
  0x15   :  { %v123_v57 = vld [vmem:[%s4065_s2 + $0x100] sm:$0xff]  ;;  %v2639_v63 = vld [vmem:[%s4067_s1 + $0x28] sm:$0xff]  ;;  %v129_v4 = vld [vmem:[%s4065_s2 + $0x130] sm:$0xff] }
  0x16   :  { %v2679_v1 = vld [vmem:[%s4067_s1 + $0x128] sm:$0xff]  ;;  %v127_v6 = vld [vmem:[%s4065_s2 + $0x120] sm:$0xff]  ;;  %v130_v10 = vld [vmem:[%s4065_s2 + $0x138] sm:$0xff] }
  0x17   :  { %v2699_v3 = vld [vmem:[%s4067_s1 + $0x1c8] sm:$0xff]  ;;  %v131_v9 = vld [vmem:[%s4065_s2 + $0x140] sm:$0xff]  ;;  %v2640_v11 = vld [vmem:[%s4067_s1 + $0x30] sm:$0xff] }
  0x18   :  { %v128_v5 = vld [vmem:[%s4065_s2 + $0x128] sm:$0xff]  ;;  %v2661_v12 = vld [vmem:[%s4067_s1 + $0xd8] sm:$0xff]  ;;  %v2680_v13 = vld [vmem:[%s4067_s1 + $0x130] sm:$0xff] }
  0x19   :  { %v132_v8 = vld [vmem:[%s4065_s2 + $0x148] sm:$0xff]  ;;  %v2700_v15 = vld [vmem:[%s4067_s1 + $0x1d0] sm:$0xff]  ;;  %v135_v16 = vld [vmem:[%s4065_s2 + $0x160] sm:$0xff] }
  0x1a   :  { %220 = vperm.xlu2 %2721, %v102_v20   ;;  %v134_v17 = vld [vmem:[%s4065_s2 + $0x158] sm:$0xff]  ;;  %v133_v18 = vld [vmem:[%s4065_s2 + $0x150] sm:$0xff] }
  0x1b   :  { %215 = vperm.xlu1 %2720, %v101_v21   ;;  %210 = vperm.xlu0 %2719, %v100_v22   ;;  %v138_v22 = vld [vmem:[%s4065_s2 + $0x178] sm:$0xff] }
  0x1c   :  { %2379 = vmatmul.msk.bf16.gmra.mxu0 %vm643_vm0, %v2635_v23  ;;  %2400 = vmatmul.msk.bf16.gmra.mxu2 %vm643_vm0, %v2656_v24  ;;  %v137_v23 = vld [vmem:[%s4065_s2 + $0x170] sm:$0xff]  ;;  %v136_v24 = vld [vmem:[%s4065_s2 + $0x168] sm:$0xff] }
  0x1d   :  { %2539 = vmatmul.msk.bf16.gmra.mxu1 %vm643_vm0, %v2675_v25  ;;  %v2641_v25 = vld [vmem:[%s4067_s1 + $0x38] sm:$0xff] }
  0x20   :  { %2559 = vmatmul.msk.bf16.gmra.mxu3 %vm643_vm0, %v2695_v26  ;;  %v2662_v26 = vld [vmem:[%s4067_s1 + $0xe0] sm:$0xff] }
  0x22   :  { %235 = vperm.xlu2 %2721, %v105_v27   ;;  %v2681_v27 = vld [vmem:[%s4067_s1 + $0x138] sm:$0xff] }
  0x23   :  { %230 = vperm.xlu1 %2720, %v104_v28   ;;  %225 = vperm.xlu0 %2719, %v103_v29   ;;  %v2701_v29 = vld [vmem:[%s4067_s1 + $0x1d8] sm:$0xff] }
  0x2a   :  { %250 = vperm.xlu2 %2721, %v108_v30  }
  0x2b   :  { %245 = vperm.xlu1 %2720, %v107_v31   ;;  %240 = vperm.xlu0 %2719, %v106_v32   ;;  %v141_v32 = vld [vmem:[%s4065_s2 + $0x190] sm:$0xff] }
  0x2c   :  { %2380 = vmatmul.msk.bf16.gmra.mxu0 %vm643_vm0, %v2636_v33  ;;  %2401 = vmatmul.msk.bf16.gmra.mxu2 %vm643_vm0, %v2657_v34  ;;  %v140_v33 = vld [vmem:[%s4065_s2 + $0x188] sm:$0xff]  ;;  %v139_v34 = vld [vmem:[%s4065_s2 + $0x180] sm:$0xff] }
  0x2d   :  { %2540 = vmatmul.msk.bf16.gmra.mxu1 %vm643_vm0, %v2676_v35 }
  0x30   :  { %2560 = vmatmul.msk.bf16.gmra.mxu3 %vm643_vm0, %v2696_v36 }
  0x32   :  { %265 = vperm.xlu2 %2721, %v111_v37  }
  0x33   :  { %260 = vperm.xlu1 %2720, %v110_v38   ;;  %255 = vperm.xlu0 %2719, %v109_v39   ;;  %v144_v38 = vld [vmem:[%s4065_s2 + $0x1a8] sm:$0xff]  ;;  %v143_v39 = vld [vmem:[%s4065_s2 + $0x1a0] sm:$0xff] }
  0x3a   :  { %280 = vperm.xlu2 %2721, %v114_v40   ;;  %v142_v40 = vld [vmem:[%s4065_s2 + $0x198] sm:$0xff] }
  0x3b   :  { %275 = vperm.xlu1 %2720, %v113_v41   ;;  %270 = vperm.xlu0 %2719, %v112_v42   ;;  %v2642_v41 = vld [vmem:[%s4067_s1 + $0x40] sm:$0xff]  ;;  %v2663_v42 = vld [vmem:[%s4067_s1 + $0xe8] sm:$0xff] }
  0x3c   :  { %2381 = vmatmul.msk.bf16.gmra.mxu0 %vm643_vm0, %v2637_v43  ;;  %2402 = vmatmul.msk.bf16.gmra.mxu2 %vm643_vm0, %v2658_v44  ;;  %v2682_v44 = vld [vmem:[%s4067_s1 + $0x140] sm:$0xff] }
  0x3d   :  { %2541 = vmatmul.msk.bf16.gmra.mxu1 %vm643_vm0, %v2677_v45 }
  0x40   :  { %2561 = vmatmul.msk.bf16.gmra.mxu3 %vm643_vm0, %v2697_v46 }
  0x42   :  { %295 = vperm.xlu2 %2721, %v117_v47  }
  0x43   :  { %290 = vperm.xlu1 %2720, %v116_v48   ;;  %285 = vperm.xlu0 %2719, %v115_v49   ;;  %v2702_v48 = vld [vmem:[%s4067_s1 + $0x1e0] sm:$0xff] }
  0x4a   :  { %310 = vperm.xlu2 %2721, %v120_v50  }
  0x4b   :  { %305 = vperm.xlu1 %2720, %v119_v51   ;;  %300 = vperm.xlu0 %2719, %v118_v52   ;;  %v147_v52 = vld [vmem:[%s4065_s2 + $0x1c0] sm:$0xff] }
  0x4c   :  { %2382 = vmatmul.msk.bf16.gmra.mxu0 %vm643_vm0, %v2638_v53  ;;  %2403 = vmatmul.msk.bf16.gmra.mxu2 %vm643_vm0, %v2659_v54  ;;  %v146_v53 = vld [vmem:[%s4065_s2 + $0x1b8] sm:$0xff]  ;;  %v145_v54 = vld [vmem:[%s4065_s2 + $0x1b0] sm:$0xff] }
  0x4d   :  { %2542 = vmatmul.msk.bf16.gmra.mxu1 %vm643_vm0, %v2678_v55 }
  0x50   :  { %2562 = vmatmul.msk.bf16.gmra.mxu3 %vm643_vm0, %v2698_v56 }
  0x52   :  { %325 = vperm.xlu2 %2721, %v123_v57  }
  0x53   :  { %320 = vperm.xlu1 %2720, %v122_v58   ;;  %315 = vperm.xlu0 %2719, %v121_v59  }
  0x5a   :  { %340 = vperm.xlu2 %2721, %v126_v60  }
  0x5b   :  { %335 = vperm.xlu1 %2720, %v125_v61   ;;  %330 = vperm.xlu0 %2719, %v124_v62  }
  0x5c   :  { %2383 = vmatmul.msk.bf16.gmra.mxu0 %vm643_vm0, %v2639_v63  ;;  %2404 = vmatmul.msk.bf16.gmra.mxu2 %vm643_vm0, %v2660_v0  ;;  %v2964_v2 = vpop.permute.xlu2 %185 }
  0x5d   :  { %2543 = vmatmul.msk.bf16.gmra.mxu1 %vm643_vm0, %v2679_v1  ;;  %v150_v1 = vld [vmem:[%s4065_s2 + $0x1d8] sm:$0xff] }
  0x60   :  { %2563 = vmatmul.msk.bf16.gmra.mxu3 %vm643_vm0, %v2699_v3  ;;  %v149_v3 = vld [vmem:[%s4065_s2 + $0x1d0] sm:$0xff] }
  0x62   :  { %355 = vperm.xlu2 %2721, %v129_v4   ;;  %v148_v4 = vld [vmem:[%s4065_s2 + $0x1c8] sm:$0xff] }
  0x63   :  { %350 = vperm.xlu1 %2720, %v128_v5   ;;  %345 = vperm.xlu0 %2719, %v127_v6   ;;  %v2643_v5 = vld [vmem:[%s4067_s1 + $0x48] sm:$0xff]  ;;  %v2664_v6 = vld [vmem:[%s4067_s1 + $0xf0] sm:$0xff] }
  0x64   :  { %v2980_v7 = vpop.permute.xlu2 %190 }
  0x6a   :  { %370 = vperm.xlu2 %2721, %v132_v8  }
  0x6b   :  { %365 = vperm.xlu1 %2720, %v131_v9   ;;  %360 = vperm.xlu0 %2719, %v130_v10   ;;  %v2683_v9 = vld [vmem:[%s4067_s1 + $0x148] sm:$0xff] }
  0x6c   :  { %2384 = vmatmul.msk.bf16.gmra.mxu0 %vm643_vm0, %v2640_v11  ;;  %2405 = vmatmul.msk.bf16.gmra.mxu2 %vm643_vm0, %v2661_v12  ;;  %v3002_v14 = vpop.permute.xlu2 %205 }
  0x6d   :  { %2544 = vmatmul.msk.bf16.gmra.mxu1 %vm643_vm0, %v2680_v13  ;;  %v2703_v13 = vld [vmem:[%s4067_s1 + $0x1e8] sm:$0xff] }
  0x70   :  { %2564 = vmatmul.msk.bf16.gmra.mxu3 %vm643_vm0, %v2700_v15 }
  0x72   :  { %385 = vperm.xlu2 %2721, %v135_v16  }
  0x73   :  { %380 = vperm.xlu1 %2720, %v134_v17   ;;  %375 = vperm.xlu0 %2719, %v133_v18   ;;  %v153_v18 = vld [vmem:[%s4065_s2 + $0x1f0] sm:$0xff] }
  0x74   :  { %v3018_v19 = vpop.permute.xlu2 %220 }
  0x75   :  { %v3020_v20 = vpop.permute.xlu1 %175  ;;  %v166_v21 = vpop.permute.xlu0 %165 }
  0x7a   :  { %400 = vperm.xlu2 %2721, %v138_v22  }
  0x7b   :  { %395 = vperm.xlu1 %2720, %v137_v23   ;;  %390 = vperm.xlu0 %2719, %v136_v24  }
  0x7c   :  { %2385 = vmatmul.msk.bf16.gmra.mxu0 %vm643_vm0, %v2641_v25  ;;  %2406 = vmatmul.msk.bf16.gmra.mxu2 %vm643_vm0, %v2662_v26  ;;  %v3042_v28 = vpop.permute.xlu2 %235 }
  0x7d   :  { %2545 = vmatmul.msk.bf16.gmra.mxu1 %vm643_vm0, %v2681_v27  ;;  %v3048_v30 = vpop.permute.xlu1 %180  ;;  %v171_v31 = vpop.permute.xlu0 %170 }
  0x80   :  { %2565 = vmatmul.msk.bf16.gmra.mxu3 %vm643_vm0, %v2701_v29 }
  0x82   :  { %415 = vperm.xlu2 %2721, %v141_v32  }
  0x83   :  { %410 = vperm.xlu1 %2720, %v140_v33   ;;  %405 = vperm.xlu0 %2719, %v139_v34   ;;  %v1069_v34 = vld [vmem:[%s4065_s2 + $0x200] sm:$0xff] }
  0x84   :  { %v3060_v35 = vpop.permute.xlu2 %250 }
  0x85   :  { %v3062_v36 = vpop.permute.xlu1 %200  ;;  %v3064_v37 = vpop.permute.xlu0 %195 }
  0x89   :  { %v749_v43 = vpop.f32.mrf.mxu0 }
  0x8a   :  { %v750_v45 = vadd.f32 %v749_v43, %v166_v21  ;;  %v3084_v46 = vpop.f32.mrf.mxu1  ;;  %430 = vperm.xlu2 %2721, %v144_v38   ;;  %v151_v21 = vld [vmem:[%s4065_s2 + $0x1e0] sm:$0xff]  ;;  %v154_v38 = vld [vmem:[%s4065_s2 + $0x1f8] sm:$0xff] }
  0x8b   :  { %425 = vperm.xlu1 %2720, %v143_v39   ;;  %420 = vperm.xlu0 %2719, %v142_v40   ;;  %v2644_v39 = vld [vmem:[%s4067_s1 + $0x50] sm:$0xff]  ;;  %v2665_v40 = vld [vmem:[%s4067_s1 + $0xf8] sm:$0xff] }
  0x8c   :  { %2386 = vmatmul.msk.bf16.gmra.mxu0 %vm643_vm0, %v2642_v41  ;;  %2407 = vmatmul.msk.bf16.gmra.mxu2 %vm643_vm0, %v2663_v42  ;;  %v3088_v47 = vpop.permute.xlu2 %265  ;;  %v909_v58 = vmax.f32 %v750_v45, 0.0  ;;  %v2684_v42 = vld [vmem:[%s4067_s1 + $0x150] sm:$0xff] }
  0x8d   :  { %2546 = vmatmul.msk.bf16.gmra.mxu1 %vm643_vm0, %v2682_v44  ;;  %v3094_v49 = vpop.permute.xlu1 %215  ;;  %v3096_v50 = vpop.permute.xlu0 %210  ;;  %v2704_v45 = vld [vmem:[%s4067_s1 + $0x1f0] sm:$0xff] }
  0x8f   :  { %v3098_v51 = vpop.f32.mrf.mxu2 }
  0x90   :  { %2566 = vmatmul.msk.bf16.gmra.mxu3 %vm643_vm0, %v2702_v48 }
  0x91   :  { %v751_v55 = vpop.f32.mrf.mxu0 }
  0x92   :  { %v752_v56 = vadd.f32 %v751_v55, %v171_v31  ;;  %v3110_v57 = vpop.f32.mrf.mxu1  ;;  %445 = vperm.xlu2 %2721, %v147_v52  }
  0x93   :  { %440 = vperm.xlu1 %2720, %v146_v53   ;;  %435 = vperm.xlu0 %2719, %v145_v54   ;;  %v1073_v54 = vld [vmem:[%s4065_s2 + $0x220] sm:$0xff] }
  0x94   :  { %v910_v59 = vmax.f32 %v752_v56, 0.0  ;;  %v3112_v60 = vpop.permute.xlu2 %280  ;;  %v1072_v56 = vld [vmem:[%s4065_s2 + $0x218] sm:$0xff] }
  0x95   :  { %v3114_v61 = vpop.permute.xlu1 %230  ;;  %v3116_v62 = vpop.permute.xlu0 %225 }
  0x96   :  { %v3118_v63 = vpack.c.bf16 %v910_v59, %v909_v58  ;;  %v1071_v58 = vld [vmem:[%s4065_s2 + $0x210] sm:$0xff] }
  0x97   :  { %v3120_v0 = vpop.f32.mrf.mxu2 }
  0x98   :  { %4071 = vst [vmem:[#allocation2_spill] sm:$0xff] %v3118_v63 }
  0x99   :  { %v754_v8 = vpop.f32.mrf.mxu0 }
  0x9a   :  { %v755_v10 = vadd.f32 %v754_v8, %v3020_v20  ;;  %v3141_v11 = vpop.f32.mrf.mxu1  ;;  %460 = vperm.xlu2 %2721, %v150_v1   ;;  %v152_v20 = vld [vmem:[%s4065_s2 + $0x1e8] sm:$0xff]  ;;  %v3225_v1 = vpop.f32.mrf.mxu3 }
  0x9b   :  { %455 = vperm.xlu1 %2720, %v149_v3   ;;  %450 = vperm.xlu0 %2719, %v148_v4   ;;  %4074 = vst [vmem:[#allocation5_spill] sm:$0xff] %v3225_v1 }
  0x9c   :  { %2387 = vmatmul.msk.bf16.gmra.mxu0 %vm643_vm0, %v2643_v5  ;;  %2408 = vmatmul.msk.bf16.gmra.mxu2 %vm643_vm0, %v2664_v6  ;;  %v3145_v12 = vpop.permute.xlu2 %295  ;;  %v911_v25 = vmax.f32 %v755_v10, 0.0 }
  0x9d   :  { %2547 = vmatmul.msk.bf16.gmra.mxu1 %vm643_vm0, %v2683_v9  ;;  %v3151_v15 = vpop.permute.xlu1 %245  ;;  %v3153_v16 = vpop.permute.xlu0 %240 }
  0x9f   :  { %v3155_v17 = vpop.f32.mrf.mxu2 }
  0xa0   :  { %2567 = vmatmul.msk.bf16.gmra.mxu3 %vm643_vm0, %v2703_v13 }
  0xa1   :  { %v756_v22 = vpop.f32.mrf.mxu0 }
  0xa2   :  { %v757_v23 = vadd.f32 %v756_v22, %v3048_v30  ;;  %v3168_v24 = vpop.f32.mrf.mxu1  ;;  %475 = vperm.xlu2 %2721, %v153_v18   ;;  %v1070_v30 = vld [vmem:[%s4065_s2 + $0x208] sm:$0xff]  ;;  %v1075_v18 = vld [vmem:[%s4065_s2 + $0x230] sm:$0xff] }
  0xa3   :  { %470 = vperm.xlu1 %2720, %v152_v20   ;;  %465 = vperm.xlu0 %2719, %v151_v21   ;;  %v1074_v20 = vld [vmem:[%s4065_s2 + $0x228] sm:$0xff]  ;;  %v2645_v21 = vld [vmem:[%s4067_s1 + $0x58] sm:$0xff] }
  0xa4   :  { %v912_v26 = vmax.f32 %v757_v23, 0.0  ;;  %v3170_v27 = vpop.permute.xlu2 %310  ;;  %v2685_v23 = vld [vmem:[%s4067_s1 + $0x158] sm:$0xff] }
  0xa5   :  { %4072 = vst [vmem:[#allocation3_spill] sm:$0xff] %v3170_v27  ;;  %v3172_v29 = vpop.permute.xlu1 %260  ;;  %v3174_v31 = vpop.permute.xlu0 %255 }
  0xa6   :  { %v3176_v32 = vpack.c.bf16 %v912_v26, %v911_v25 }
  0xa7   :  { %v3178_v33 = vpop.f32.mrf.mxu2 }
  0xa8   :  { %4073 = vst [vmem:[#allocation4_spill] sm:$0xff] %v3176_v32 }
  0xa9   :  { %v759_v41 = vpop.f32.mrf.mxu0 }
  0xaa   :  { %v3198_v43 = vpop.f32.mrf.mxu1  ;;  %1148 = vperm.xlu2 %2721, %v1070_v30   ;;  %v760_v55 = vadd.f32 %v759_v41, %v2964_v2  ;;  %v3258_v30 = vpop.f32.mrf.mxu3  ;;  %v1079_v41 = vld [vmem:[%s4065_s2 + $0x250] sm:$0xff] }
  0xab   :  { %1143 = vperm.xlu1 %2720, %v1069_v34   ;;  %480 = vperm.xlu0 %2719, %v154_v38   ;;  %v2705_v38 = vld [vmem:[%s4067_s1 + $0x1f8] sm:$0xff] }
  0xac   :  { %2388 = vmatmul.msk.bf16.gmra.mxu0 %vm643_vm0, %v2644_v39  ;;  %2409 = vmatmul.msk.bf16.gmra.mxu2 %vm643_vm0, %v2665_v40  ;;  %v3202_v44 = vpop.permute.xlu2 %325  ;;  %v913_v2 = vmax.f32 %v760_v55, 0.0 }
  0xad   :  { %2548 = vmatmul.msk.bf16.gmra.mxu1 %vm643_vm0, %v2684_v42  ;;  %v3208_v48 = vpop.permute.xlu1 %275  ;;  %v3210_v52 = vpop.permute.xlu0 %270  ;;  %v1078_v42 = vld [vmem:[%s4065_s2 + $0x248] sm:$0xff] }
  0xaf   :  { %v3212_v53 = vpop.f32.mrf.mxu2 }
  0xb0   :  { %2568 = vmatmul.msk.bf16.gmra.mxu3 %vm643_vm0, %v2704_v45  ;;  %v1077_v45 = vld [vmem:[%s4065_s2 + $0x240] sm:$0xff] }
  0xb1   :  { %v761_v59 = vpop.f32.mrf.mxu0 }
  0xb2   :  { %v762_v3 = vadd.f32 %v761_v59, %v2980_v7  ;;  %v3228_v4 = vpop.f32.mrf.mxu1  ;;  %1163 = vperm.xlu2 %2721, %v1073_v54   ;;  %v1076_v7 = vld [vmem:[%s4065_s2 + $0x238] sm:$0xff] }
  0xb3   :  { %1158 = vperm.xlu1 %2720, %v1072_v56   ;;  %1153 = vperm.xlu0 %2719, %v1071_v58  }
  0xb4   :  { %v914_v5 = vmax.f32 %v762_v3, 0.0  ;;  %v3230_v6 = vpop.permute.xlu2 %340 }
  0xb5   :  { %4075 = vst [vmem:[#allocation6_spill] sm:$0xff] %v3230_v6  ;;  %v3232_v8 = vpop.permute.xlu1 %290  ;;  %v3234_v9 = vpop.permute.xlu0 %285 }
  0xb6   :  { %v3236_v10 = vpack.c.bf16 %v914_v5, %v913_v2 }
  0xb7   :  { %v3238_v13 = vpop.f32.mrf.mxu2 }
  0xb8   :  { %4076 = vst [vmem:[#allocation7_spill] sm:$0xff] %v3236_v10 }
  0xb9   :  { %v764_v22 = vpop.f32.mrf.mxu0 }
  0xba   :  { %v765_v25 = vadd.f32 %v764_v22, %v3064_v37  ;;  %v3256_v26 = vpop.f32.mrf.mxu1  ;;  %1178 = vperm.xlu2 %2721, %v1076_v7   ;;  %v3292_v7 = vpop.f32.mrf.mxu3  ;;  %v1080_v22 = vld [vmem:[%s4065_s2 + $0x258] sm:$0xff] }
  0xbb   :  { %1173 = vperm.xlu1 %2720, %v1075_v18   ;;  %1168 = vperm.xlu0 %2719, %v1074_v20  }
  0xbc   :  { %2389 = vmatmul.msk.bf16.gmra.mxu0 %vm643_vm0, %v2645_v21  ;;  %v3261_v34 = vpop.permute.xlu2 %355  ;;  %v915_v58 = vmax.f32 %v765_v25, 0.0  ;;  %v1081_v21 = vld [vmem:[%s4065_s2 + $0x260] sm:$0xff] }
  0xbd   :  { %4077 = vst [vmem:[#allocation8_spill] sm:$0xff] %v3261_v34  ;;  %2549 = vmatmul.msk.bf16.gmra.mxu1 %vm643_vm0, %v2685_v23  ;;  %v3267_v39 = vpop.permute.xlu1 %305  ;;  %v3269_v37 = vpop.permute.xlu0 %300  ;;  %v2646_v23 = vld [vmem:[%s4067_s1 + $0x60] sm:$0xff] }
  0xbe   :  { %4078 = vst [vmem:[#allocation9_spill] sm:$0xff] %v3267_v39 }
  0xbf   :  { %v3271_v40 = vpop.f32.mrf.mxu2 }
  0xc0   :  { %2569 = vmatmul.msk.bf16.gmra.mxu3 %vm643_vm0, %v2705_v38  ;;  %v2686_v38 = vld [vmem:[%s4067_s1 + $0x160] sm:$0xff] }
  0xc1   :  { %v766_v54 = vpop.f32.mrf.mxu0 }
  0xc2   :  { %v767_v55 = vadd.f32 %v766_v54, %v3062_v36  ;;  %v3284_v56 = vpop.f32.mrf.mxu1  ;;  %1193 = vperm.xlu2 %2721, %v1079_v41   ;;  %v1083_v36 = vld [vmem:[%s4065_s2 + $0x270] sm:$0xff] }
  0xc3   :  { %1188 = vperm.xlu1 %2720, %v1078_v42   ;;  %1183 = vperm.xlu0 %2719, %v1077_v45  }
  0xc4   :  { %v916_v59 = vmax.f32 %v767_v55, 0.0  ;;  %v3286_v3 = vpop.permute.xlu2 %370 }
  0xc5   :  { %4079 = vst [vmem:[#allocation10_spill] sm:$0xff] %v3286_v3  ;;  %v3288_v2 = vpop.permute.xlu1 %320  ;;  %v3290_v5 = vpop.permute.xlu0 %315 }
  0xc6   :  { %4080 = vst [vmem:[#allocation11_spill] sm:$0xff] %v3288_v2  ;;  %v3294_v18 = vpack.c.bf16 %v916_v59, %v915_v58  ;;  %v1100_v59 = vld [vmem:[%s4065_s2 + $0x2f8] sm:$0xff] }
  0xc7   :  { %4081 = vst [vmem:[#allocation12_spill] sm:$0xff] %v3290_v5  ;;  %v3296_v20 = vpop.f32.mrf.mxu2 }
  0xc8   :  { %4082 = vst [vmem:[#allocation13_spill] sm:$0xff] %v3294_v18  ;;  %v1093_v18 = vld [vmem:[%s4065_s2 + $0x2c0] sm:$0xff] }
  0xc9   :  { %v769_v25 = vpop.f32.mrf.mxu0 }
  0xca   :  { %v3313_v41 = vpop.f32.mrf.mxu1  ;;  %1213 = vperm.xlu2 %2721, %v1083_v36   ;;  %v3327_v36 = vpop.f32.mrf.mxu3 }
  0xcb   :  { %1203 = vperm.xlu1 %2720, %v1081_v21   ;;  %1198 = vperm.xlu0 %2719, %v1080_v22   ;;  %v770_v21 = vadd.f32 %v769_v25, %v3002_v14  ;;  %v1099_v22 = vld [vmem:[%s4065_s2 + $0x2f0] sm:$0xff] }
  0xcc   :  { %2390 = vmatmul.msk.bf16.gmra.mxu0 %vm643_vm0, %v2646_v23  ;;  %v386_v42 = vpop.permute.xlu2 %385 }
  0xcd   :  { %2550 = vmatmul.msk.bf16.gmra.mxu1 %vm643_vm0, %v2686_v38  ;;  %v3318_v45 = vadd.f32 %v3155_v17, %v386_v42  ;;  %v3320_v54 = vpop.permute.xlu1 %335  ;;  %v3322_v55 = vpop.permute.xlu0 %330  ;;  %v1084_v17 = vld [vmem:[%s4065_s2 + $0x278] sm:$0xff] }
  0xce   :  { %4083 = vst [vmem:[#allocation14_spill] sm:$0xff] %v3320_v54  ;;  %v917_v54 = vmax.f32 %v770_v21, 0.0  ;;  %v1082_v21 = vld [vmem:[%s4065_s2 + $0x268] sm:$0xff] }
  0xcf   :  { %v874_v58 = vpop.f32.mrf.mxu2 }
  0xd1   :  { %v771_v23 = vpop.f32.mrf.mxu0 }
  0xd2   :  { %v772_v38 = vadd.f32 %v771_v23, %v3096_v50  ;;  %v3337_v42 = vpop.f32.mrf.mxu1  ;;  %1298 = vperm.xlu2 %2721, %v1100_v59   ;;  %v1098_v50 = vld [vmem:[%s4065_s2 + $0x2e8] sm:$0xff]  ;;  %v1097_v59 = vld [vmem:[%s4065_s2 + $0x2e0] sm:$0xff] }
  0xd3   :  { %1293 = vperm.xlu1 %2720, %v1099_v22   ;;  %1218 = vperm.xlu0 %2719, %v1084_v17   ;;  %v2647_v22 = vld [vmem:[%s4067_s1 + $0x68] sm:$0xff]  ;;  %v3362_v17 = vpop.f32.mrf.mxu3 }
  0xd4   :  { %v918_v6 = vmax.f32 %v772_v38, 0.0  ;;  %v401_v34 = vpop.permute.xlu2 %400 }
  0xd5   :  { %v3339_v14 = vpop.permute.xlu1 %350  ;;  %v3341_v25 = vpop.permute.xlu0 %345 }
  0xd6   :  { %4084 = vst [vmem:[#allocation15_spill] sm:$0xff] %v3339_v14  ;;  %v3343_v3 = vpack.c.bf16 %v918_v6, %v917_v54  ;;  %v2687_v54 = vld [vmem:[%s4067_s1 + $0x168] sm:$0xff] }
  0xd7   :  { %4085 = vst [vmem:[#allocation16_spill] sm:$0xff] %v3341_v25  ;;  %v3345_v63 = vpop.f32.mrf.mxu2 }
  0xd8   :  { %4086 = vst [vmem:[#allocation17_spill] sm:$0xff] %v3343_v3 }
  0xd9   :  { %v774_v6 = vpop.f32.mrf.mxu0 }
  0xda   :  { %v3364_v23 = vpop.f32.mrf.mxu1  ;;  %1288 = vperm.xlu2 %2721, %v1098_v50   ;;  %v775_v50 = vadd.f32 %v774_v6, %v3094_v49 }
  0xdb   :  { %1283 = vperm.xlu1 %2720, %v1097_v59   ;;  %1208 = vperm.xlu0 %2719, %v1082_v21   ;;  %v1096_v59 = vld [vmem:[%s4065_s2 + $0x2d8] sm:$0xff] }
  0xdc   :  { %2391 = vmatmul.msk.bf16.gmra.mxu0 %vm643_vm0, %v2647_v22  ;;  %v416_v38 = vpop.permute.xlu2 %415 }
  0xdd   :  { %2551 = vmatmul.msk.bf16.gmra.mxu1 %vm643_vm0, %v2687_v54  ;;  %v3368_v25 = vadd.f32 %v874_v58, %v416_v38  ;;  %v3370_v14 = vpop.permute.xlu1 %365  ;;  %v3372_v32 = vpop.permute.xlu0 %360  ;;  %v1095_v58 = vld [vmem:[%s4065_s2 + $0x2d0] sm:$0xff] }
  0xde   :  { %4087 = vst [vmem:[#allocation18_spill] sm:$0xff] %v3370_v14  ;;  %v3389_v38 = vpop.f32.mrf.mxu3 }
  0xdf   :  { %4088 = vst [vmem:[#allocation19_spill] sm:$0xff] %v3372_v32  ;;  %v3374_v10 = vpop.f32.mrf.mxu2  ;;  %v919_v32 = vmax.f32 %v775_v50, 0.0  ;;  %v1091_v50 = vld [vmem:[%s4065_s2 + $0x2b0] sm:$0xff] }
  0xe1   :  { %v776_v21 = vpop.f32.mrf.mxu0 }
  0xe2   :  { %v777_v22 = vadd.f32 %v776_v21, %v3018_v19  ;;  %v3387_v54 = vpop.f32.mrf.mxu1  ;;  %1263 = vperm.xlu2 %2721, %v1093_v18   ;;  %v1092_v18 = vld [vmem:[%s4065_s2 + $0x2b8] sm:$0xff]  ;;  %v1094_v21 = vld [vmem:[%s4065_s2 + $0x2c8] sm:$0xff] }
  0xe3   :  { %1278 = vperm.xlu1 %2720, %v1096_v59   ;;  %1273 = vperm.xlu0 %2719, %v1095_v58  }
  0xe4   :  { %v920_v49 = vmax.f32 %v777_v22, 0.0  ;;  %v3391_v6 = vpop.permute.xlu2 %430 }
  0xe5   :  { %v381_v14 = vpop.permute.xlu1 %380  ;;  %v376_v3 = vpop.permute.xlu0 %375 }
  0xe6   :  { %v857_v39 = vadd.f32 %v3120_v0, %v381_v14  ;;  %v855_v27 = vadd.f32 %v3098_v51, %v376_v3  ;;  %v3395_v5 = vpack.c.bf16 %v920_v49, %v919_v32  ;;  %v2648_v51 = vld [vmem:[%s4067_s1 + $0x70] sm:$0xff] }
  0xe7   :  { %v881_v19 = vpop.f32.mrf.mxu2  ;;  %v2688_v32 = vld [vmem:[%s4067_s1 + $0x170] sm:$0xff] }
  0xe8   :  { %4089 = vst [vmem:[#allocation20_spill] sm:$0xff] %v3395_v5  ;;  %v952_v59 = vmax.f32 %v857_v39, 0.0  ;;  %v951_v58 = vmax.f32 %v855_v27, 0.0  ;;  %v867_v39 = vadd.f32 %v3238_v13, %v401_v34  ;;  %v3419_v5 = vpop.f32.mrf.mxu3  ;;  %v1087_v13 = vld [vmem:[%s4065_s2 + $0x290] sm:$0xff] }
  0xe9   :  { %v779_v0 = vpop.f32.mrf.mxu0 }
  0xea   :  { %v3412_v3 = vpack.c.bf16 %v952_v59, %v951_v58  ;;  %v3414_v27 = vpop.f32.mrf.mxu1  ;;  %1258 = vperm.xlu2 %2721, %v1092_v18   ;;  %v953_v58 = vmax.f32 %v3318_v45, 0.0  ;;  %v956_v34 = vmax.f32 %v867_v39, 0.0 }
  0xeb   :  { %1253 = vperm.xlu1 %2720, %v1091_v50   ;;  %1268 = vperm.xlu0 %2719, %v1094_v21   ;;  %v780_v50 = vadd.f32 %v779_v0, %v3116_v62 }
  0xec   :  { %4090 = vst [vmem:[#allocation21_spill] sm:$0xff] %v3412_v3  ;;  %2392 = vmatmul.msk.bf16.gmra.mxu0 %vm643_vm0, %v2648_v51  ;;  %v446_v14 = vpop.permute.xlu2 %445 }
  0xed   :  { %2552 = vmatmul.msk.bf16.gmra.mxu1 %vm643_vm0, %v2688_v32  ;;  %v396_v22 = vpop.permute.xlu1 %395  ;;  %v391_v49 = vpop.permute.xlu0 %390  ;;  %v1090_v32 = vld [vmem:[%s4065_s2 + $0x2a8] sm:$0xff]  ;;  %v921_v62 = vmax.f32 %v780_v50, 0.0 }
  0xee   :  { %v865_v2 = vadd.f32 %v3212_v53, %v396_v22  ;;  %v862_v59 = vadd.f32 %v3178_v33, %v391_v49  ;;  %v1089_v33 = vld [vmem:[%s4065_s2 + $0x2a0] sm:$0xff] }
  0xef   :  { %v3424_v18 = vpop.f32.mrf.mxu2 }
  0xf0   :  { %v955_v21 = vmax.f32 %v865_v2, 0.0  ;;  %v954_v51 = vmax.f32 %v862_v59, 0.0 }
  0xf1   :  { %v781_v53 = vpop.f32.mrf.mxu0 }
  0xf2   :  { %v3436_v45 = vpack.c.bf16 %v956_v34, %v955_v21  ;;  %v3438_v22 = vpack.c.bf16 %v954_v51, %v953_v58  ;;  %v782_v49 = vadd.f32 %v781_v53, %v3114_v61  ;;  %v3441_v39 = vpop.f32.mrf.mxu1  ;;  %1233 = vperm.xlu2 %2721, %v1087_v13   ;;  %v1086_v61 = vld [vmem:[%s4065_s2 + $0x288] sm:$0xff]  ;;  %v3452_v13 = vpop.f32.mrf.mxu3 }
  0xf3   :  { %1248 = vperm.xlu1 %2720, %v1090_v32   ;;  %1243 = vperm.xlu0 %2719, %v1089_v33   ;;  %v1085_v32 = vld [vmem:[%s4065_s2 + $0x280] sm:$0xff]  ;;  %v2689_v33 = vld [vmem:[%s4067_s1 + $0x178] sm:$0xff] }
  0xf4   :  { %4091 = vst [vmem:[#allocation22_spill] sm:$0xff] %v3436_v45  ;;  %v922_v2 = vmax.f32 %v782_v49, 0.0  ;;  %v3443_v0 = vpop.permute.xlu2 %460  ;;  %v882_v49 = vadd.f32 %v881_v19, %v3391_v6  ;;  %v1131_v6 = vld [vmem:[%s4065_s2 + $0x3f0] sm:$0xff] }
  0xf5   :  { %4092 = vst [vmem:[#allocation23_spill] sm:$0xff] %v3438_v22  ;;  %v411_v59 = vpop.permute.xlu1 %410  ;;  %v406_v3 = vpop.permute.xlu0 %405 }
  0xf6   :  { %v872_v1 = vadd.f32 %v3296_v20, %v411_v59  ;;  %v870_v34 = vadd.f32 %v3271_v40, %v406_v3  ;;  %v3447_v21 = vpack.c.bf16 %v922_v2, %v921_v62  ;;  %v1088_v20 = vld [vmem:[%s4065_s2 + $0x298] sm:$0xff] }
  0xf7   :  { %v886_v58 = vpop.f32.mrf.mxu2  ;;  %v2649_v40 = vld [vmem:[%s4067_s1 + $0x78] sm:$0xff] }
  0xf8   :  { %4093 = vst [vmem:[#allocation24_spill] sm:$0xff] %v3447_v21  ;;  %v958_v51 = vmax.f32 %v872_v1, 0.0  ;;  %v957_v50 = vmax.f32 %v870_v34, 0.0 }
  0xf9   :  { %v784_v3 = vpop.f32.mrf.mxu0 }
  0xfa   :  { %v3466_v53 = vpack.c.bf16 %v958_v51, %v957_v50  ;;  %v3468_v1 = vpop.f32.mrf.mxu1  ;;  %1228 = vperm.xlu2 %2721, %v1086_v61   ;;  %v959_v50 = vmax.f32 %v3368_v25, 0.0  ;;  %v785_v19 = vadd.f32 %v784_v3, %v3042_v28  ;;  %v3488_v25 = vpop.f32.mrf.mxu3 }
  0xfb   :  { %1223 = vperm.xlu1 %2720, %v1085_v32   ;;  %1238 = vperm.xlu0 %2719, %v1088_v20   ;;  %4095 = vst [vmem:[#allocation26_spill] sm:$0xff] %v3488_v25 }
  0xfc   :  { %4094 = vst [vmem:[#allocation25_spill] sm:$0xff] %v3466_v53  ;;  %2393 = vmatmul.msk.bf16.gmra.mxu0 %vm643_vm0, %v2649_v40  ;;  %v3472_v62 = vpop.permute.xlu2 %475  ;;  %v962_v53 = vmax.f32 %v882_v49, 0.0 }
  0xfd   :  { %2553 = vmatmul.msk.bf16.gmra.mxu1 %vm643_vm0, %v2689_v33  ;;  %v426_v2 = vpop.permute.xlu1 %425  ;;  %v421_v59 = vpop.permute.xlu0 %420  ;;  %v1116_v33 = vld [vmem:[%s4065_s2 + $0x378] sm:$0xff] }
  0xfe   :  { %v880_v34 = vadd.f32 %v3374_v10, %v426_v2  ;;  %v877_v51 = vadd.f32 %v3345_v63, %v421_v59  ;;  %v1115_v63 = vld [vmem:[%s4065_s2 + $0x370] sm:$0xff] }
  0xff   :  { %v889_v61 = vpop.f32.mrf.mxu2 }
 0x100   :  { %v961_v32 = vmax.f32 %v880_v34, 0.0  ;;  %v960_v20 = vmax.f32 %v877_v51, 0.0  ;;  %v890_v40 = vadd.f32 %v889_v61, %v446_v14  ;;  %v923_v14 = vmax.f32 %v785_v19, 0.0  ;;  %v1113_v19 = vld [vmem:[%s4065_s2 + $0x360] sm:$0xff] }
 0x101   :  { %v786_v10 = vpop.f32.mrf.mxu0 }
 0x102   :  { %v3490_v49 = vpack.c.bf16 %v962_v53, %v961_v32  ;;  %v3492_v2 = vpack.c.bf16 %v960_v20, %v959_v50  ;;  %v787_v28 = vadd.f32 %v786_v10, %v3153_v16  ;;  %v3495_v3 = vpop.f32.mrf.mxu1  ;;  %1453 = vperm.xlu2 %2721, %v1131_v6   ;;  %v1114_v16 = vld [vmem:[%s4065_s2 + $0x368] sm:$0xff]  ;;  %v1132_v20 = vld [vmem:[%s4065_s2 + $0x3f8] sm:$0xff]  ;;  %v3521_v10 = vpop.f32.mrf.mxu3 }
 0x103   :  { %1378 = vperm.xlu1 %2720, %v1116_v33   ;;  %1373 = vperm.xlu0 %2719, %v1115_v63   ;;  %v2690_v33 = vld [vmem:[%s4067_s1 + $0x180] sm:$0xff]  ;;  %4100 = vst [vmem:[#allocation31_spill] sm:$0xff] %v3521_v10 }
 0x104   :  { %4096 = vst [vmem:[#allocation27_spill] sm:$0xff] %v3490_v49  ;;  %v924_v59 = vmax.f32 %v787_v28, 0.0  ;;  %v3497_v34 = vpop.permute.xlu2 %1148 }
 0x105   :  { %4097 = vst [vmem:[#allocation28_spill] sm:$0xff] %v3492_v2  ;;  %v441_v51 = vpop.permute.xlu1 %440  ;;  %v436_v61 = vpop.permute.xlu0 %435 }
 0x106   :  { %v3499_v22 = vpack.c.bf16 %v924_v59, %v923_v14  ;;  %v887_v45 = vadd.f32 %v886_v58, %v441_v51  ;;  %v885_v53 = vadd.f32 %v3424_v18, %v436_v61  ;;  %v2650_v58 = vld [vmem:[%s4067_s1 + $0x80] sm:$0xff] }
 0x107   :  { %v891_v50 = vpop.f32.mrf.mxu2 }
 0x108   :  { %4098 = vst [vmem:[#allocation29_spill] sm:$0xff] %v3499_v22  ;;  %v964_v32 = vmax.f32 %v887_v45, 0.0  ;;  %v963_v6 = vmax.f32 %v885_v53, 0.0  ;;  %v1111_v53 = vld [vmem:[%s4065_s2 + $0x350] sm:$0xff] }
 0x109   :  { %v789_v18 = vpop.f32.mrf.mxu0 }
 0x10a   :  { %v3517_v63 = vpack.c.bf16 %v964_v32, %v963_v6  ;;  %v3519_v45 = vpop.f32.mrf.mxu1  ;;  %1368 = vperm.xlu2 %2721, %v1114_v16   ;;  %v965_v32 = vmax.f32 %v890_v40, 0.0  ;;  %v790_v16 = vadd.f32 %v789_v18, %v3151_v15  ;;  %v3544_v49 = vpop.f32.mrf.mxu3 }
 0x10b   :  { %1363 = vperm.xlu1 %2720, %v1113_v19   ;;  %1458 = vperm.xlu0 %2719, %v1132_v20   ;;  %v1130_v19 = vld [vmem:[%s4065_s2 + $0x3e8] sm:$0xff]  ;;  %v1129_v20 = vld [vmem:[%s4065_s2 + $0x3e0] sm:$0xff]  ;;  %4103 = vst [vmem:[#allocation34_spill] sm:$0xff] %v3544_v49 }
 0x10c   :  { %4099 = vst [vmem:[#allocation30_spill] sm:$0xff] %v3517_v63  ;;  %2394 = vmatmul.msk.bf16.gmra.mxu0 %vm643_vm0, %v2650_v58  ;;  %v3524_v28 = vpop.permute.xlu2 %1163  ;;  %v925_v15 = vmax.f32 %v790_v16, 0.0  ;;  %v1127_v16 = vld [vmem:[%s4065_s2 + $0x3d0] sm:$0xff] }
 0x10d   :  { %2554 = vmatmul.msk.bf16.gmra.mxu1 %vm643_vm0, %v2690_v33  ;;  %v456_v14 = vpop.permute.xlu1 %455  ;;  %v451_v59 = vpop.permute.xlu0 %450 }
 0x10e   :  { %v892_v51 = vadd.f32 %v891_v50, %v451_v59 }
 0x10f   :  { %v894_v61 = vpop.f32.mrf.mxu2 }
 0x110   :  { %v966_v6 = vmax.f32 %v892_v51, 0.0  ;;  %v895_v63 = vadd.f32 %v894_v61, %v456_v14  ;;  %v2651_v14 = vld [vmem:[%s4067_s1 + $0x88] sm:$0xff] }
 0x111   :  { %v791_v58 = vpop.f32.mrf.mxu0 }
 0x112   :  { %v3537_v33 = vpack.c.bf16 %v966_v6, %v965_v32  ;;  %v792_v50 = vadd.f32 %v791_v58, %v3060_v35  ;;  %v3540_v59 = vpop.f32.mrf.mxu1  ;;  %1353 = vperm.xlu2 %2721, %v1111_v53   ;;  %v1128_v35 = vld [vmem:[%s4065_s2 + $0x3d8] sm:$0xff] }
 0x113   :  { %4102 = vst [vmem:[#allocation33_spill] sm:$0xff] %v3540_v59  ;;  %1448 = vperm.xlu1 %2720, %v1130_v19   ;;  %1443 = vperm.xlu0 %2719, %v1129_v20   ;;  %v1112_v6 = vld [vmem:[%s4065_s2 + $0x358] sm:$0xff]  ;;  %v2691_v19 = vld [vmem:[%s4067_s1 + $0x188] sm:$0xff]  ;;  %v967_v20 = vmax.f32 %v895_v63, 0.0 }
 0x114   :  { %4101 = vst [vmem:[#allocation32_spill] sm:$0xff] %v3537_v33  ;;  %v926_v40 = vmax.f32 %v792_v50, 0.0  ;;  %v3542_v18 = vpop.permute.xlu2 %1178  ;;  %v1729_v50 = vadd.f32 %v3110_v57, %v3497_v34  ;;  %v3580_v57 = vpop.f32.mrf.mxu3 }
 0x115   :  { %v471_v51 = vpop.permute.xlu1 %470  ;;  %v466_v2 = vpop.permute.xlu0 %465  ;;  %4106 = vst [vmem:[#allocation37_spill] sm:$0xff] %v3580_v57 }
 0x116   :  { %v3546_v21 = vpack.c.bf16 %v926_v40, %v925_v15 }
 0x117   :  { %v896_v32 = vpop.f32.mrf.mxu2 }
 0x118   :  { %4104 = vst [vmem:[#allocation35_spill] sm:$0xff] %v3546_v21  ;;  %v897_v53 = vadd.f32 %v896_v32, %v3443_v0 }
 0x119   :  { %v794_v61 = vpop.f32.mrf.mxu0 }
 0x11a   :  { %v968_v58 = vmax.f32 %v897_v53, 0.0  ;;  %v3564_v0 = vpop.f32.mrf.mxu1  ;;  %1438 = vperm.xlu2 %2721, %v1128_v35   ;;  %v1125_v35 = vld [vmem:[%s4065_s2 + $0x3c0] sm:$0xff]  ;;  %v795_v34 = vadd.f32 %v794_v61, %v3174_v31 }
 0x11b   :  { %1433 = vperm.xlu1 %2720, %v1127_v16   ;;  %1358 = vperm.xlu0 %2719, %v1112_v6   ;;  %v1887_v16 = vmax.f32 %v1729_v50, 0.0 }
 0x11c   :  { %v3568_v15 = vpack.c.bf16 %v968_v58, %v967_v20  ;;  %2395 = vmatmul.msk.bf16.gmra.mxu0 %vm643_vm0, %v2651_v14  ;;  %v3571_v40 = vpop.permute.xlu2 %1193  ;;  %v1110_v14 = vld [vmem:[%s4065_s2 + $0x348] sm:$0xff]  ;;  %v927_v31 = vmax.f32 %v795_v34, 0.0 }
 0x11d   :  { %2555 = vmatmul.msk.bf16.gmra.mxu1 %vm643_vm0, %v2691_v19  ;;  %v1144_v32 = vpop.permute.xlu1 %1143  ;;  %v3574_v33 = vpop.permute.xlu0 %480  ;;  %v1109_v19 = vld [vmem:[%s4065_s2 + $0x340] sm:$0xff]  ;;  %v1126_v34 = vld [vmem:[%s4065_s2 + $0x3c8] sm:$0xff] }
 0x11e   :  { %4105 = vst [vmem:[#allocation36_spill] sm:$0xff] %v3568_v15  ;;  %v1727_v63 = vadd.f32 %v3084_v46, %v1144_v32 }
 0x11f   :  { %v899_v53 = vpop.f32.mrf.mxu2 }
 0x120   :  { %v1886_v6 = vmax.f32 %v1727_v63, 0.0  ;;  %v900_v21 = vadd.f32 %v899_v53, %v466_v2  ;;  %v2652_v2 = vld [vmem:[%s4067_s1 + $0x90] sm:$0xff] }
 0x121   :  { %v796_v46 = vpop.f32.mrf.mxu0 }
 0x122   :  { %v797_v20 = vadd.f32 %v796_v46, %v3172_v29  ;;  %v3590_v58 = vpop.f32.mrf.mxu1  ;;  %1423 = vperm.xlu2 %2721, %v1125_v35   ;;  %v3592_v50 = vpack.c.bf16 %v1887_v16, %v1886_v6  ;;  %v1108_v29 = vld [vmem:[%s4065_s2 + $0x338] sm:$0xff]  ;;  %v1107_v16 = vld [vmem:[%s4065_s2 + $0x330] sm:$0xff] }
 0x123   :  { %1348 = vperm.xlu1 %2720, %v1110_v14   ;;  %1343 = vperm.xlu0 %2719, %v1109_v19   ;;  %v2692_v6 = vld [vmem:[%s4067_s1 + $0x190] sm:$0xff]  ;;  %v3617_v14 = vpop.f32.mrf.mxu3 }
 0x124   :  { %v928_v61 = vmax.f32 %v797_v20, 0.0  ;;  %v3594_v32 = vpop.permute.xlu2 %1213  ;;  %4108 = vst [vmem:[#allocation39_spill] sm:$0xff] %v3617_v14 }
 0x125   :  { %v3596_v63 = vpop.permute.xlu1 %1158  ;;  %v3598_v15 = vpop.permute.xlu0 %1153 }
 0x126   :  { %v3600_v22 = vpack.c.bf16 %v928_v61, %v927_v31 }
 0x127   :  { %v901_v25 = vpop.f32.mrf.mxu2 }
 0x128   :  { %4107 = vst [vmem:[#allocation38_spill] sm:$0xff] %v3600_v22  ;;  %v902_v35 = vadd.f32 %v901_v25, %v471_v51  ;;  %v969_v25 = vmax.f32 %v900_v21, 0.0  ;;  %v1105_v21 = vld [vmem:[%s4065_s2 + $0x320] sm:$0xff] }
 0x129   :  { %v799_v53 = vpop.f32.mrf.mxu0 }
 0x12a   :  { %v970_v51 = vmax.f32 %v902_v35, 0.0  ;;  %v3619_v19 = vpop.f32.mrf.mxu1  ;;  %1338 = vperm.xlu2 %2721, %v1108_v29   ;;  %v800_v29 = vadd.f32 %v799_v53, %v3088_v47  ;;  %v1124_v35 = vld [vmem:[%s4065_s2 + $0x3b8] sm:$0xff] }
 0x12b   :  { %1333 = vperm.xlu1 %2720, %v1107_v16   ;;  %1428 = vperm.xlu0 %2719, %v1126_v34   ;;  %v1123_v16 = vld [vmem:[%s4065_s2 + $0x3b0] sm:$0xff] }
 0x12c   :  { %v3621_v46 = vpack.c.bf16 %v970_v51, %v969_v25  ;;  %2396 = vmatmul.msk.bf16.gmra.mxu0 %vm643_vm0, %v2652_v2  ;;  %v3624_v20 = vpop.permute.xlu2 %1298  ;;  %v3644_v25 = vpop.f32.mrf.mxu3  ;;  %v929_v51 = vmax.f32 %v800_v29, 0.0  ;;  %v1121_v29 = vld [vmem:[%s4065_s2 + $0x3a0] sm:$0xff] }
 0x12d   :  { %2556 = vmatmul.msk.bf16.gmra.mxu1 %vm643_vm0, %v2692_v6  ;;  %v3627_v31 = vpop.permute.xlu1 %1173  ;;  %v3629_v61 = vpop.permute.xlu0 %1168  ;;  %4110 = vst [vmem:[#allocation41_spill] sm:$0xff] %v3644_v25 }
 0x12e   :  { %4109 = vst [vmem:[#allocation40_spill] sm:$0xff] %v3621_v46 }
 0x12f   :  { %v904_v22 = vpop.f32.mrf.mxu2 }
 0x130   :  { %v905_v10 = vadd.f32 %v904_v22, %v3472_v62  ;;  %v2653_v22 = vld [vmem:[%s4067_s1 + $0x98] sm:$0xff] }
 0x131   :  { %v801_v34 = vpop.f32.mrf.mxu0 }
 0x132   :  { %v802_v2 = vadd.f32 %v801_v34, %v3210_v52  ;;  %v3642_v6 = vpop.f32.mrf.mxu1  ;;  %1323 = vperm.xlu2 %2721, %v1105_v21   ;;  %v1122_v21 = vld [vmem:[%s4065_s2 + $0x3a8] sm:$0xff]  ;;  %v2693_v34 = vld [vmem:[%s4067_s1 + $0x198] sm:$0xff] }
 0x133   :  { %1418 = vperm.xlu1 %2720, %v1124_v35   ;;  %1413 = vperm.xlu0 %2719, %v1123_v16   ;;  %v1106_v16 = vld [vmem:[%s4065_s2 + $0x328] sm:$0xff] }
 0x134   :  { %v930_v47 = vmax.f32 %v802_v2, 0.0  ;;  %v3653_v49 = vpop.permute.xlu2 %1288  ;;  %v971_v2 = vmax.f32 %v905_v10, 0.0  ;;  %v3677_v25 = vpop.f32.mrf.mxu3  ;;  %v1119_v10 = vld [vmem:[%s4065_s2 + $0x390] sm:$0xff] }
 0x135   :  { %v3646_v53 = vpop.permute.xlu1 %1188  ;;  %v3648_v46 = vpop.permute.xlu0 %1183  ;;  %4113 = vst [vmem:[#allocation44_spill] sm:$0xff] %v3677_v25 }
 0x136   :  { %v3651_v57 = vpack.c.bf16 %v930_v47, %v929_v51 }
 0x137   :  { %v906_v52 = vpop.f32.mrf.mxu2 }
 0x138   :  { %4111 = vst [vmem:[#allocation42_spill] sm:$0xff] %v3651_v57  ;;  %v907_v35 = vadd.f32 %v906_v52, %v3574_v33 }
 0x139   :  { %v804_v62 = vpop.f32.mrf.mxu0 }
 0x13a   :  { %v972_v51 = vmax.f32 %v907_v35, 0.0  ;;  %v3671_v33 = vpop.f32.mrf.mxu1  ;;  %1408 = vperm.xlu2 %2721, %v1122_v21   ;;  %v805_v35 = vadd.f32 %v804_v62, %v3208_v48  ;;  %v1104_v21 = vld [vmem:[%s4065_s2 + $0x318] sm:$0xff]  ;;  %v1762_v48 = vadd.f32 %v3468_v1, %v3594_v32  ;;  %v1101_v1 = vld [vmem:[%s4065_s2 + $0x300] sm:$0xff] }
 0x13b   :  { %1403 = vperm.xlu1 %2720, %v1121_v29   ;;  %1328 = vperm.xlu0 %2719, %v1106_v16   ;;  %v1103_v29 = vld [vmem:[%s4065_s2 + $0x310] sm:$0xff]  ;;  %v1120_v32 = vld [vmem:[%s4065_s2 + $0x398] sm:$0xff] }
 0x13c   :  { %v3673_v47 = vpack.c.bf16 %v972_v51, %v971_v2  ;;  %2397 = vmatmul.msk.bf16.gmra.mxu0 %vm643_vm0, %v2653_v22  ;;  %v3683_v14 = vpop.permute.xlu2 %1263  ;;  %v931_v62 = vmax.f32 %v805_v35, 0.0 }
 0x13d   :  { %2557 = vmatmul.msk.bf16.gmra.mxu1 %vm643_vm0, %v2693_v34  ;;  %v1204_v52 = vpop.permute.xlu1 %1203  ;;  %v1199_v57 = vpop.permute.xlu0 %1198 }
 0x13e   :  { %4112 = vst [vmem:[#allocation43_spill] sm:$0xff] %v3673_v47 }
 0x141   :  { %v806_v16 = vpop.f32.mrf.mxu0 }
 0x142   :  { %v807_v22 = vadd.f32 %v806_v16, %v3112_v60  ;;  %v3692_v34 = vpop.f32.mrf.mxu1  ;;  %1393 = vperm.xlu2 %2721, %v1119_v10   ;;  %v1102_v60 = vld [vmem:[%s4065_s2 + $0x308] sm:$0xff]  ;;  %v1900_v16 = vmax.f32 %v1762_v48, 0.0  ;;  %v3704_v10 = vpop.f32.mrf.mxu3 }
 0x143   :  { %1318 = vperm.xlu1 %2720, %v1104_v21   ;;  %1313 = vperm.xlu0 %2719, %v1103_v29   ;;  %4115 = vst [vmem:[#allocation46_spill] sm:$0xff] %v3704_v10  ;;  %v2214_v10 = vld [vmem:[%s4068_s4] sm:$0xff] }
 0x144   :  { %v932_v2 = vmax.f32 %v807_v22, 0.0  ;;  %v1259_v35 = vpop.permute.xlu2 %1258 }
 0x145   :  { %v3696_v51 = vpop.permute.xlu1 %1293  ;;  %v1219_v47 = vpop.permute.xlu0 %1218 }
 0x146   :  { %v3698_v25 = vpack.c.bf16 %v932_v2, %v931_v62  ;;  %v1764_v59 = vadd.f32 %v3495_v3, %v1219_v47  ;;  %v2654_v3 = vld [vmem:[%s4067_s1 + $0xa0] sm:$0xff]  ;;  %v1754_v2 = vadd.f32 %v3387_v54, %v1199_v57 }
 0x147   :  { %v1117_v54 = vld [vmem:[%s4065_s2 + $0x380] sm:$0xff] }
 0x148   :  { %4114 = vst [vmem:[#allocation45_spill] sm:$0xff] %v3698_v25  ;;  %v1901_v21 = vmax.f32 %v1764_v59, 0.0  ;;  %v1757_v59 = vadd.f32 %v3414_v27, %v1204_v52 }
 0x149   :  { %v809_v47 = vpop.f32.mrf.mxu0 }
 0x14a   :  { %v3715_v29 = vpop.f32.mrf.mxu1  ;;  %1308 = vperm.xlu2 %2721, %v1102_v60   ;;  %v1957_v22 = vpack.c.bf16 %v1901_v21, %v1900_v16  ;;  %v1752_v60 = vadd.f32 %v3364_v23, %v3571_v40  ;;  %v1898_v16 = vmax.f32 %v1757_v59, 0.0  ;;  %v810_v27 = vadd.f32 %v809_v47, %v3234_v9  ;;  %v1118_v21 = vld [vmem:[%s4065_s2 + $0x388] sm:$0xff] }
 0x14b   :  { %1303 = vperm.xlu1 %2720, %v1101_v1   ;;  %1398 = vperm.xlu0 %2719, %v1120_v32   ;;  %v3737_v1 = vpop.f32.mrf.mxu3  ;;  %v1747_v23 = vadd.f32 %v3313_v41, %v3648_v46  ;;  %v1897_v40 = vmax.f32 %v1754_v2, 0.0  ;;  %v2217_v2 = vld [vmem:[%s4068_s4 + $0x18] sm:$0xff] }
 0x14c   :  { %2398 = vmatmul.msk.bf16.gmra.mxu0 %vm643_vm0, %v2654_v3  ;;  %2022 = vmatpush.bf16.msrb.mxu2 %v1957_v22  ;;  %v1896_v3 = vmax.f32 %v1752_v60, 0.0  ;;  %v933_v47 = vmax.f32 %v810_v27, 0.0  ;;  %v3744_v22 = vpop.permute.xlu2 %1233  ;;  %v1744_v60 = vadd.f32 %v3284_v56, %v3542_v18  ;;  %v1737_v56 = vadd.f32 %v3198_v43, %v3524_v28 }
 0x14d   :  { %v3719_v48 = vpop.permute.xlu1 %1283  ;;  %v1209_v62 = vpop.permute.xlu0 %1208  ;;  %v1894_v46 = vmax.f32 %v1747_v23, 0.0  ;;  %v1734_v23 = vadd.f32 %v3168_v24, %v3596_v63 }
 0x14e   :  { %v1759_v25 = vadd.f32 %v3441_v39, %v1209_v62  ;;  %v1749_v39 = vadd.f32 %v3337_v42, %v3646_v53  ;;  %v1742_v53 = vadd.f32 %v3256_v26, %v3627_v31  ;;  %v2216_v26 = vld [vmem:[%s4068_s4 + $0x10] sm:$0xff]  ;;  %v2215_v31 = vld [vmem:[%s4068_s4 + $0x8] sm:$0xff]  ;;  %v1893_v18 = vmax.f32 %v1744_v60, 0.0 }
 0x150   :  { %v1899_v52 = vmax.f32 %v1759_v25, 0.0  ;;  %v1892_v27 = vmax.f32 %v1742_v53, 0.0 }
 0x151   :  { %v811_v57 = vpop.f32.mrf.mxu0 }
 0x152   :  { %v812_v9 = vadd.f32 %v811_v57, %v3232_v8  ;;  %v3742_v25 = vpop.f32.mrf.mxu1  ;;  %2220 = vperm.xlu2 %2721, %v2214_v10   ;;  %v1956_v32 = vpack.c.bf16 %v1899_v52, %v1898_v16  ;;  %v1895_v8 = vmax.f32 %v1749_v39, 0.0  ;;  %v1955_v10 = vpack.c.bf16 %v1897_v40, %v1896_v3 }
 0x153   :  { %1388 = vperm.xlu1 %2720, %v1118_v21   ;;  %1383 = vperm.xlu0 %2719, %v1117_v54   ;;  %v1739_v52 = vadd.f32 %v3228_v4, %v3629_v61  ;;  %v3771_v39 = vpop.f32.mrf.mxu3  ;;  %v1784_v57 = vadd.f32 %v3692_v34, %v1259_v35  ;;  %v1732_v61 = vadd.f32 %v3141_v11, %v3598_v15  ;;  %v1890_v3 = vmax.f32 %v1737_v56, 0.0 }
 0x154   :  { %v934_v42 = vmax.f32 %v812_v9, 0.0  ;;  %2023 = vmatpush.bf16.msrb.mxu2 %v1956_v32  ;;  %v1954_v54 = vpack.c.bf16 %v1895_v8, %v1894_v46  ;;  %v3780_v32 = vpop.permute.xlu2 %1228  ;;  %v1953_v28 = vpack.c.bf16 %v1893_v18, %v1892_v27 }
 0x155   :  { %v3748_v59 = vpop.permute.xlu1 %1278  ;;  %v3750_v41 = vpop.permute.xlu0 %1273  ;;  %v1891_v9 = vmax.f32 %v1739_v52, 0.0  ;;  %v1888_v63 = vmax.f32 %v1732_v61, 0.0 }
 0x156   :  { %v3752_v62 = vpack.c.bf16 %v934_v42, %v933_v47  ;;  %v1909_v47 = vmax.f32 %v1784_v57, 0.0  ;;  %v1889_v42 = vmax.f32 %v1734_v23, 0.0 }
 0x157   :  { %v1952_v46 = vpack.c.bf16 %v1891_v9, %v1890_v3 }
 0x158   :  { %2024 = vmatpush.bf16.msrb.mxu2 %v1955_v10 }
 0x159   :  { %v814_v16 = vpop.f32.mrf.mxu0 }
 0x15a   :  { %v3767_v21 = vpop.f32.mrf.mxu1  ;;  %2235 = vperm.xlu2 %2721, %v2217_v2   ;;  %v815_v34 = vadd.f32 %v814_v16, %v3145_v12 }
 0x15b   :  { %2230 = vperm.xlu1 %2720, %v2216_v26   ;;  %2225 = vperm.xlu0 %2719, %v2215_v31   ;;  %v1951_v31 = vpack.c.bf16 %v1889_v42, %v1888_v63  ;;  %v3791_v16 = vpop.f32.mrf.mxu3 }
 0x15c   :  { %2025 = vmatpush.bf16.msrb.mxu2 %v1954_v54  ;;  %v935_v15 = vmax.f32 %v815_v34, 0.0  ;;  %v3793_v27 = vpop.permute.xlu2 %1453 }
 0x15d   :  { %v1254_v40 = vpop.permute.xlu1 %1253  ;;  %v3776_v4 = vpop.permute.xlu0 %1268 }
 0x15e   :  { %v1782_v43 = vadd.f32 %v3671_v33, %v1254_v40 }
 0x160   :  { %v1908_v35 = vmax.f32 %v1782_v43, 0.0  ;;  %2026 = vmatpush.bf16.msrb.mxu2 %v1953_v28 }
 0x161   :  { %v816_v24 = vpop.f32.mrf.mxu0 }
 0x162   :  { %v817_v53 = vadd.f32 %v816_v24, %v3269_v37  ;;  %v1793_v8 = vpop.f32.mrf.mxu1  ;;  %v3785_v11 = vpack.c.bf16 %v1909_v47, %v1908_v35 }
 0x164   :  { %v936_v10 = vmax.f32 %v817_v53, 0.0  ;;  %2027 = vmatpush.bf16.msrb.mxu2 %v1952_v46  ;;  %v1369_v40 = vpop.permute.xlu2 %1368 }
 0x165   :  { %v1249_v33 = vpop.permute.xlu1 %1248  ;;  %v1244_v2 = vpop.permute.xlu0 %1243  ;;  %v1839_v63 = vadd.f32 %v3389_v38, %v1369_v40 }
 0x166   :  { %v3787_v60 = vpack.c.bf16 %v936_v10, %v935_v15  ;;  %v1779_v12 = vadd.f32 %v3642_v6, %v1249_v33  ;;  %v1777_v26 = vadd.f32 %v3619_v19, %v1244_v2  ;;  %v3804_v19 = vpop.f32.mrf.mxu3 }
 0x168   :  { %v1907_v37 = vmax.f32 %v1779_v12, 0.0  ;;  %v1906_v52 = vmax.f32 %v1777_v26, 0.0  ;;  %2028 = vmatpush.bf16.msrb.mxu2 %v1951_v31 }
 0x169   :  { %v3795_v54 = vpop.f32.mrf.mxu0 }
 0x16a   :  { %v1796_v56 = vpop.f32.mrf.mxu1  ;;  %v3797_v18 = vpack.c.bf16 %v1907_v37, %v1906_v52 }
 0x16b   :  { %v1797_v38 = vadd.f32 %v1796_v56, %v3719_v48 }
 0x16c   :  { %2029 = vmatpush.bf16.msrb.mxu2 %v3592_v50  ;;  %v1354_v53 = vpop.permute.xlu2 %1353 }
 0x16d   :  { %v3800_v57 = vpop.permute.xlu1 %1223  ;;  %v3802_v6 = vpop.permute.xlu0 %1238 }
 0x16e   :  { %v3812_v24 = vpop.f32.mrf.mxu3 }
 0x171   :  { %v3806_v23 = vpop.f32.mrf.mxu0 }
 0x172   :  { %v1798_v61 = vpop.f32.mrf.mxu1 }
 0x173   :  { %v1799_v31 = vadd.f32 %v1798_v61, %v3653_v49  ;;  %v1792_v49 = vadd.f32 %v3767_v21, %v3750_v41  ;;  %v1789_v61 = vadd.f32 %v3742_v25, %v3776_v4  ;;  %v2572_v21 = vld [vmem:[%s4069_s3 + $0x10] sm:$0xf] }
 0x174   :  { %v2708_v25 = vld [vmem:[%s4069_s3 + $0x2c] sm:$0xf0] }
 0x175   :  { %v1379_v9 = vpop.permute.xlu1 %1378  ;;  %v1374_v43 = vpop.permute.xlu0 %1373 }
 0x176   :  { %v1844_v28 = vadd.f32 %v3452_v13, %v1379_v9  ;;  %v1842_v3 = vadd.f32 %v3419_v5, %v1374_v43  ;;  %v1931_v13 = vmax.f32 %v1839_v63, 0.0  ;;  %v3828_v43 = vpop.f32.mrf.mxu3 }
 0x178   :  { %v1933_v47 = vmax.f32 %v1844_v28, 0.0  ;;  %v1932_v34 = vmax.f32 %v1842_v3, 0.0  ;;  %v1794_v28 = vadd.f32 %v1793_v8, %v3748_v59  ;;  %v1915_v3 = vmax.f32 %v1799_v31, 0.0 }
 0x179   :  { %v3810_v35 = vpop.f32.mrf.mxu0  ;;  %v1787_v59 = vadd.f32 %v3715_v29, %v3683_v14  ;;  %v1912_v8 = vmax.f32 %v1792_v49, 0.0 }
 0x17a   :  { %v1973_v50 = vpack.c.bf16 %v1933_v47, %v1932_v34  ;;  %v1801_v42 = vpop.f32.mrf.mxu1  ;;  %v1913_v34 = vmax.f32 %v1794_v28, 0.0 }
 0x17b   :  { %v1802_v5 = vadd.f32 %v1801_v42, %v3696_v51  ;;  %v3830_v51 = vpop.permute.xlu2 %1438  ;;  %v1832_v42 = vadd.f32 %v3292_v7, %v1354_v53  ;;  %v1911_v7 = vmax.f32 %v1789_v61, 0.0 }
 0x17c   :  { %2060 = vmatpush.bf16.msra.mxu2 %v1973_v50  ;;  %v1963_v53 = vpack.c.bf16 %v1913_v34, %v1912_v8  ;;  %v1772_v34 = vadd.f32 %v3564_v0, %v3744_v22 }
 0x17d   :  { %v1364_v46 = vpop.permute.xlu1 %1363  ;;  %v3815_v15 = vpop.permute.xlu0 %1458  ;;  %v1916_v52 = vmax.f32 %v1802_v5, 0.0  ;;  %v1928_v14 = vmax.f32 %v1832_v42, 0.0  ;;  %v1910_v5 = vmax.f32 %v1787_v59, 0.0 }
 0x17e   :  { %v1837_v10 = vadd.f32 %v3362_v17, %v1364_v46  ;;  %v2573_v46 = vor.u32 %v2708_v25, %v2572_v21  ;;  %v2588_v25 = vld [vmem:[%s4069_s3 + $0x50] sm:$0xf] }
 0x180   :  { %v1930_v33 = vmax.f32 %v1837_v10, 0.0  ;;  %v1881_v10 = vpop.f32.mrf.mxu3  ;;  %2030 = vmatmul.bf16.vlgmr.msrb.gmra.mxu2 %v2573_v46 }
 0x181   :  { %v3819_v2 = vpop.f32.mrf.mxu0  ;;  %v1882_v0 = vadd.f32 %v1881_v10, %v3793_v27  ;;  %v2574_v10 = vld [vmem:[%s4069_s3 + $0x30] sm:$0xf0] }
 0x182   :  { %v1972_v12 = vpack.c.bf16 %v1931_v13, %v1930_v33  ;;  %v1803_v26 = vpop.f32.mrf.mxu1 }
 0x183   :  { %v1804_v37 = vadd.f32 %v1803_v26, %v3624_v20  ;;  %v1914_v20 = vmax.f32 %v1797_v38, 0.0  ;;  %v3851_v29 = vpop.permute.xlu2 %1423 }
 0x184   :  { %2061 = vmatpush.bf16.msra.mxu2 %v1972_v12 }
 0x185   :  { %v1917_v40 = vmax.f32 %v1804_v37, 0.0  ;;  %v3824_v9 = vpop.permute.xlu1 %1448  ;;  %v3826_v17 = vpop.permute.xlu0 %1443  ;;  %v1964_v50 = vpack.c.bf16 %v1915_v3, %v1914_v20  ;;  %v1774_v20 = vadd.f32 %v3590_v58, %v3802_v6  ;;  %v1904_v58 = vmax.f32 %v1772_v34, 0.0  ;;  %v4117_v6 = vld [vmem:[#allocation33_spill] sm:$0xff] }
 0x186   :  { %v1769_v21 = vadd.f32 %v4117_v6, %v3780_v32  ;;  %v1879_v32 = vadd.f32 %v3828_v43, %v3824_v9  ;;  %v1877_v27 = vadd.f32 %v3812_v24, %v3826_v17 }
 0x187   :  { %v1965_v47 = vpack.c.bf16 %v1917_v40, %v1916_v52  ;;  %v1905_v8 = vmax.f32 %v1774_v20, 0.0 }
 0x188   :  { %v1947_v9 = vmax.f32 %v1879_v32, 0.0  ;;  %v1946_v43 = vmax.f32 %v1877_v27, 0.0 }
 0x189   :  { %2041 = vmatpush.bf16.msrb.mxu3 %v1965_v47  ;;  %v829_v48 = vpop.f32.mrf.mxu0  ;;  %v4116_v47 = vld [vmem:[#allocation5_spill] sm:$0xff]  ;;  %v1959_v46 = vpack.c.bf16 %v1905_v8, %v1904_v58  ;;  %v4120_v8 = vld [vmem:[#allocation39_spill] sm:$0xff] }
 0x18a   :  { %v3835_v56 = vpop.f32.mrf.mxu1  ;;  %v830_v13 = vadd.f32 %v829_v48, %v3202_v44  ;;  %v1883_v48 = vpop.f32.mrf.mxu3  ;;  %v4121_v58 = vld [vmem:[#allocation41_spill] sm:$0xff] }
 0x18c   :  { %v941_v38 = vmax.f32 %v830_v13, 0.0 }
 0x18d   :  { %2042 = vmatpush.bf16.msrb.mxu3 %v1964_v50  ;;  %v3842_v63 = vpop.permute.xlu1 %1433  ;;  %v1359_v41 = vpop.permute.xlu0 %1358 }
 0x18e   :  { %v1834_v4 = vadd.f32 %v3327_v36, %v1359_v41  ;;  %v1962_v36 = vpack.c.bf16 %v1911_v7, %v1910_v5  ;;  %v3866_v50 = vpop.permute.xlu2 %1338  ;;  %v1884_v41 = vadd.f32 %v1883_v48, %v3815_v15  ;;  %v1948_v7 = vmax.f32 %v1882_v0, 0.0  ;;  %v4119_v48 = vld [vmem:[#allocation44_spill] sm:$0xff] }
 0x18f   :  { %v1872_v24 = vadd.f32 %v3791_v16, %v3842_v63 }
 0x190   :  { %v1929_v33 = vmax.f32 %v1834_v4, 0.0  ;;  %v1949_v4 = vmax.f32 %v1884_v41, 0.0  ;;  %v2590_v41 = vld [vmem:[%s4069_s3 + $0x70] sm:$0xf0] }
 0x191   :  { %2043 = vmatpush.bf16.msrb.mxu3 %v1963_v53  ;;  %v831_v12 = vpop.f32.mrf.mxu0  ;;  %v2706_v53 = vld [vmem:[%s4069_s3 + $0x14] sm:$0xf] }
 0x192   :  { %v1971_v26 = vpack.c.bf16 %v1929_v33, %v1928_v14  ;;  %v832_v31 = vadd.f32 %v831_v12, %v3322_v55  ;;  %v3855_v37 = vpop.f32.mrf.mxu1  ;;  %v1981_v13 = vpack.c.bf16 %v1949_v4, %v1948_v7  ;;  %v2577_v17 = vor.u32 %v2706_v53, %v2574_v10 }
 0x194   :  { %v942_v52 = vmax.f32 %v832_v31, 0.0  ;;  %2062 = vmatpush.bf16.msra.mxu2 %v1971_v26  ;;  %v1874_v31 = vadd.f32 %v3804_v19, %v3830_v51 }
 0x195   :  { %2044 = vmatpush.bf16.msrb.mxu3 %v1962_v36  ;;  %v1349_v40 = vpop.permute.xlu1 %1348  ;;  %v1344_v28 = vpop.permute.xlu0 %1343  ;;  %v1980_v36 = vpack.c.bf16 %v1947_v9, %v1946_v43 }
 0x196   :  { %v3857_v3 = vpack.c.bf16 %v942_v52, %v941_v38  ;;  %v1829_v44 = vadd.f32 %v3258_v30, %v1349_v40  ;;  %v1827_v49 = vadd.f32 %v4116_v47, %v1344_v28  ;;  %v1767_v30 = vadd.f32 %v3519_v45, %v3800_v57  ;;  %v2712_v45 = vld [vmem:[%s4069_s3 + $0x6c] sm:$0xf0]  ;;  %v3897_v5 = vpop.permute.xlu2 %1323 }
 0x197   :  { %v2589_v57 = vor.u32 %v2712_v45, %v2588_v25  ;;  %v1944_v38 = vmax.f32 %v1872_v24, 0.0  ;;  %v1945_v40 = vmax.f32 %v1874_v31, 0.0  ;;  %v1867_v28 = vadd.f32 %v3737_v1, %v3851_v29  ;;  %v2710_v29 = vld [vmem:[%s4069_s3 + $0x54] sm:$0xf] }
 0x198   :  { %v1927_v55 = vmax.f32 %v1829_v44, 0.0  ;;  %v1926_v61 = vmax.f32 %v1827_v49, 0.0  ;;  %v1902_v15 = vmax.f32 %v1767_v30, 0.0  ;;  %v4118_v49 = vld [vmem:[#allocation46_spill] sm:$0xff]  ;;  %v2593_v25 = vor.u32 %v2710_v29, %v2590_v41 }
 0x199   :  { %2045 = vmatpush.bf16.msrb.mxu3 %v3785_v11  ;;  %2035 = vmatmul.bf16.gmra.mxu2 %v2589_v57  ;;  %v1979_v16 = vpack.c.bf16 %v1945_v40, %v1944_v38  ;;  %v3906_v63 = vpop.f32.mrf.mxu0  ;;  %v4125_v40 = vld [vmem:[#allocation12_spill] sm:$0xff] }
 0x19a   :  { %v1970_v42 = vpack.c.bf16 %v1927_v55, %v1926_v61  ;;  %v3868_v59 = vpop.f32.mrf.mxu1  ;;  %v1942_v61 = vmax.f32 %v1867_v28, 0.0  ;;  %v825_v28 = vadd.f32 %v3810_v35, %v4125_v40  ;;  %v4136_v40 = vld [vmem:[#allocation38_spill] sm:$0xff] }
 0x19c   :  { %2063 = vmatpush.bf16.msra.mxu2 %v1970_v42 }
 0x19d   :  { %2046 = vmatpush.bf16.msrb.mxu3 %v3797_v18  ;;  %v3877_v22 = vpop.permute.xlu1 %1333  ;;  %v1429_v11 = vpop.permute.xlu0 %1428  ;;  %v1903_v18 = vmax.f32 %v1769_v21, 0.0 }
 0x19e   :  { %v1869_v52 = vadd.f32 %v3771_v39, %v1429_v11  ;;  %v1409_v39 = vpop.permute.xlu2 %1408 }
 0x19f   :  { %v1958_v33 = vpack.c.bf16 %v1903_v18, %v1902_v15  ;;  %v1859_v6 = vadd.f32 %v4121_v58, %v1409_v39  ;;  %v4122_v18 = vld [vmem:[#allocation34_spill] sm:$0xff] }
 0x1a0   :  { %v1943_v47 = vmax.f32 %v1869_v52, 0.0  ;;  %v4128_v39 = vld [vmem:[#allocation26_spill] sm:$0xff] }
 0x1a1   :  { %2047 = vmatpush.bf16.msrb.mxu3 %v1959_v46  ;;  %v1939_v15 = vmax.f32 %v1859_v6, 0.0  ;;  %v3918_v4 = vpop.f32.mrf.mxu0 }
 0x1a2   :  { %v3895_v14 = vpop.f32.mrf.mxu1  ;;  %v1978_v34 = vpack.c.bf16 %v1943_v47, %v1942_v61 }
 0x1a5   :  { %2048 = vmatpush.bf16.msrb.mxu3 %v1958_v33  ;;  %v1419_v12 = vpop.permute.xlu1 %1418  ;;  %v1414_v26 = vpop.permute.xlu0 %1413 }
 0x1a6   :  { %v1864_v20 = vadd.f32 %v4118_v49, %v1419_v12  ;;  %v1862_v19 = vadd.f32 %v4119_v48, %v1414_v26  ;;  %v1394_v32 = vpop.permute.xlu2 %1393  ;;  %v4124_v12 = vld [vmem:[#allocation11_spill] sm:$0xff] }
 0x1a7   :  { %v1852_v7 = vadd.f32 %v4122_v18, %v1394_v32  ;;  %v827_v26 = vadd.f32 %v3819_v2, %v4124_v12  ;;  %v4127_v2 = vld [vmem:[#allocation31_spill] sm:$0xff]  ;;  %v4132_v12 = vld [vmem:[#allocation45_spill] sm:$0xff] }
 0x1a8   :  { %2049 = vmatmul.bf16.vlgmr.msrb.gmra.mxu3 %v2577_v17  ;;  %v1941_v42 = vmax.f32 %v1864_v20, 0.0  ;;  %v1940_v30 = vmax.f32 %v1862_v19, 0.0  ;;  %v4126_v19 = vld [vmem:[#allocation3_spill] sm:$0xff] }
 0x1a9   :  { %2079 = vmatpush.bf16.msra.mxu3 %v1981_v13  ;;  %v4123_v13 = vld [vmem:[#allocation37_spill] sm:$0xff]  ;;  %v1936_v9 = vmax.f32 %v1852_v7, 0.0  ;;  %v3922_v43 = vpop.f32.mrf.mxu0 }
 0x1aa   :  { %v1816_v44 = vpop.f32.mrf.mxu1  ;;  %v1977_v0 = vpack.c.bf16 %v1941_v42, %v1940_v30  ;;  %v2580_v7 = vld [vmem:[%s4069_s3 + $0x18] sm:$0xf] }
 0x1ad   :  { %2080 = vmatpush.bf16.msra.mxu3 %v1980_v36  ;;  %v1404_v51 = vpop.permute.xlu1 %1403  ;;  %v1329_v55 = vpop.permute.xlu0 %1328 }
 0x1ae   :  { %v1857_v1 = vadd.f32 %v4120_v8, %v1404_v51  ;;  %v940_v51 = vmax.f32 %v827_v26, 0.0 }
 0x1b0   :  { %v1938_v11 = vmax.f32 %v1857_v1, 0.0  ;;  %v4129_v1 = vld [vmem:[#allocation9_spill] sm:$0xff] }
 0x1b1   :  { %2081 = vmatpush.bf16.msra.mxu3 %v1979_v16  ;;  %v1817_v16 = vadd.f32 %v1816_v44, %v3897_v5  ;;  %v2707_v5 = vld [vmem:[%s4069_s3 + $0x1c] sm:$0xf]  ;;  %v820_v29 = vadd.f32 %v3795_v54, %v4129_v1  ;;  %v3945_v6 = vpop.f32.mrf.mxu0  ;;  %v4149_v1 = vld [vmem:[#allocation23_spill] sm:$0xff] }
 0x1b2   :  { %v1818_v21 = vpop.f32.mrf.mxu1  ;;  %v1976_v46 = vpack.c.bf16 %v1939_v15, %v1938_v11  ;;  %v2582_v44 = vld [vmem:[%s4069_s3 + $0x38] sm:$0xf0] }
 0x1b3   :  { %v1819_v38 = vadd.f32 %v1818_v21, %v1329_v55  ;;  %v1922_v41 = vmax.f32 %v1817_v16, 0.0  ;;  %v937_v15 = vmax.f32 %v820_v29, 0.0  ;;  %v2670_v29 = vld [vmem:[%s4069_s3 + $0x44] sm:$0xf] }
 0x1b5   :  { %2082 = vmatpush.bf16.msra.mxu3 %v1978_v34  ;;  %v1319_v45 = vpop.permute.xlu1 %1318  ;;  %v1314_v57 = vpop.permute.xlu0 %1313  ;;  %v1923_v34 = vmax.f32 %v1819_v38, 0.0  ;;  %v2713_v38 = vld [vmem:[%s4069_s3 + $0x74] sm:$0xf0] }
 0x1b6   :  { %v1812_v35 = vadd.f32 %v3868_v59, %v1314_v57  ;;  %v1309_v59 = vpop.permute.xlu2 %1308 }
 0x1b7   :  { %v1968_v11 = vpack.c.bf16 %v1923_v34, %v1922_v41  ;;  %v4143_v34 = vld [vmem:[#allocation2_spill] sm:$0xff] }
 0x1b8   :  { %2054 = vmatmul.bf16.gmra.mxu3 %v2593_v25  ;;  %v2622_v41 = vld [vmem:[%s4069_s3 + $0x60] sm:$0xf0] }
 0x1b9   :  { %2083 = vmatpush.bf16.msra.mxu3 %v1977_v0  ;;  %v2585_v0 = vor.u32 %v2707_v5, %v2582_v44  ;;  %v4146_v5 = vld [vmem:[#allocation10_spill] sm:$0xff] }
 0x1ba   :  { %v1821_v27 = vpop.f32.mrf.mxu1 }
 0x1bb   :  { %v1822_v17 = vadd.f32 %v1821_v27, %v3877_v22  ;;  %v822_v22 = vadd.f32 %v3806_v23, %v4126_v19  ;;  %v939_v23 = vmax.f32 %v825_v28, 0.0  ;;  %v4137_v28 = vld [vmem:[#allocation13_spill] sm:$0xff]  ;;  %v4140_v19 = vld [vmem:[#allocation43_spill] sm:$0xff] }
 0x1bd   :  { %2084 = vmatpush.bf16.msra.mxu3 %v1976_v46  ;;  %v1304_v53 = vpop.permute.xlu1 %1303  ;;  %v1399_v10 = vpop.permute.xlu0 %1398  ;;  %v1924_v47 = vmax.f32 %v1822_v17, 0.0  ;;  %v988_v58 = vpack.c.bf16 %v940_v51, %v939_v23  ;;  %v1809_v46 = vadd.f32 %v3855_v37, %v1309_v59  ;;  %v4141_v51 = vld [vmem:[#allocation4_spill] sm:$0xff] }
 0x1be   :  { %v1854_v33 = vadd.f32 %v4123_v13, %v1399_v10  ;;  %v1807_v57 = vadd.f32 %v3835_v56, %v1304_v53  ;;  %v2709_v56 = vld [vmem:[%s4069_s3 + $0x34] sm:$0xf0]  ;;  %v844_v10 = vpop.f32.mrf.mxu0  ;;  %v4147_v23 = vld [vmem:[#allocation32_spill] sm:$0xff] }
 0x1bf   :  { %v1919_v18 = vmax.f32 %v1809_v46, 0.0  ;;  %v2581_v37 = vor.u32 %v2709_v56, %v2580_v7  ;;  %v4130_v13 = vld [vmem:[#allocation29_spill] sm:$0xff] }
 0x1c0   :  { %v1937_v24 = vmax.f32 %v1854_v33, 0.0  ;;  %v1918_v27 = vmax.f32 %v1807_v57, 0.0  ;;  %v2711_v33 = vld [vmem:[%s4069_s3 + $0x5c] sm:$0xf]  ;;  %v2625_v57 = vor.u32 %v2670_v29, %v2622_v41 }
 0x1c2   :  { %v1975_v31 = vpack.c.bf16 %v1937_v24, %v1936_v9  ;;  %v1823_v36 = vpop.f32.mrf.mxu1  ;;  %v1966_v53 = vpack.c.bf16 %v1919_v18, %v1918_v27  ;;  %v2598_v9 = vld [vmem:[%s4069_s3 + $0x78] sm:$0xf0]  ;;  %v4131_v24 = vld [vmem:[#allocation24_spill] sm:$0xff]  ;;  %v4155_v27 = vld [vmem:[#allocation27_spill] sm:$0xff] }
 0x1c3   :  { %v1824_v52 = vadd.f32 %v1823_v36, %v3866_v50  ;;  %v1814_v50 = vadd.f32 %v3895_v14, %v1319_v45  ;;  %v938_v14 = vmax.f32 %v822_v22, 0.0  ;;  %v1920_v45 = vmax.f32 %v1812_v35, 0.0  ;;  %v2596_v36 = vld [vmem:[%s4069_s3 + $0x58] sm:$0xf]  ;;  %v4145_v35 = vld [vmem:[#allocation22_spill] sm:$0xff]  ;;  %v4156_v18 = vld [vmem:[#allocation16_spill] sm:$0xff] }
 0x1c4   :  { %2085 = vmatpush.bf16.msra.mxu3 %v1975_v31  ;;  %v2601_v17 = vor.u32 %v2711_v33, %v2598_v9  ;;  %v4134_v31 = vld [vmem:[#allocation42_spill] sm:$0xff]  ;;  %v840_v7 = vadd.f32 %v3922_v43, %v4156_v18  ;;  %v4158_v9 = vld [vmem:[#allocation28_spill] sm:$0xff] }
 0x1c5   :  { %v1925_v49 = vmax.f32 %v1824_v52, 0.0  ;;  %v1389_v20 = vpop.permute.xlu1 %1388  ;;  %v1384_v48 = vpop.permute.xlu0 %1383  ;;  %v1921_v25 = vmax.f32 %v1814_v50, 0.0  ;;  %v987_v54 = vpack.c.bf16 %v938_v14, %v937_v15  ;;  %v2597_v52 = vor.u32 %v2713_v38, %v2596_v36  ;;  %v4144_v50 = vld [vmem:[#allocation36_spill] sm:$0xff]  ;;  %v4150_v14 = vld [vmem:[#allocation19_spill] sm:$0xff]  ;;  %v2620_v33 = vld [vmem:[%s4069_s3 + $0x40] sm:$0xf] }
 0x1c6   :  { %v1849_v61 = vadd.f32 %v4127_v2, %v1389_v20  ;;  %v1847_v55 = vadd.f32 %v4128_v39, %v1384_v48  ;;  %v846_v26 = vpop.f32.mrf.mxu0  ;;  %v4138_v20 = vld [vmem:[#allocation35_spill] sm:$0xff]  ;;  %v4142_v2 = vld [vmem:[#allocation40_spill] sm:$0xff]  ;;  %v2668_v39 = vld [vmem:[%s4069_s3 + $0x1c] sm:$0xf0] }
 0x1c7   :  { %v1969_v42 = vpack.c.bf16 %v1925_v49, %v1924_v47  ;;  %v1967_v32 = vpack.c.bf16 %v1921_v25, %v1920_v45  ;;  %v2666_v47 = vld [vmem:[%s4069_s3 + $0x4] sm:$0xf]  ;;  %v4139_v48 = vld [vmem:[#allocation7_spill] sm:$0xff]  ;;  %v4153_v45 = vld [vmem:[#allocation21_spill] sm:$0xff] }
 0x1c8   :  { %v1935_v30 = vmax.f32 %v1849_v61, 0.0  ;;  %v1934_v8 = vmax.f32 %v1847_v55, 0.0  ;;  %v2606_v49 = vld [vmem:[%s4069_s3 + $0x20] sm:$0xf0]  ;;  %v2604_v61 = vld [vmem:[%s4069_s3] sm:$0xf] }
 0x1c9   :  { %2064 = vmatpush.bf16.msra.mxu2 %v1969_v42  ;;  %v2609_v22 = vor.u32 %v2666_v47, %v2606_v49  ;;  %v2605_v42 = vor.u32 %v2668_v39, %v2604_v61  ;;  %v4154_v15 = vld [vmem:[#allocation15_spill] sm:$0xff] }
 0x1ca   :  { %v1974_v21 = vpack.c.bf16 %v1935_v30, %v1934_v8  ;;  %v4148_v30 = vld [vmem:[#allocation18_spill] sm:$0xff]  ;;  %v842_v46 = vadd.f32 %v3945_v6, %v4154_v15  ;;  %v2667_v36 = vld [vmem:[%s4069_s3 + $0xc] sm:$0xf]  ;;  %v2628_v49 = vld [vmem:[%s4069_s3 + $0x48] sm:$0xf] }
 0x1cb   :  { %v2672_v6 = vld [vmem:[%s4069_s3 + $0x5c] sm:$0xf0]  ;;  %v2614_v38 = vld [vmem:[%s4069_s3 + $0x28] sm:$0xf0] }
 0x1cc   :  { %2086 = vmatpush.bf16.msra.mxu3 %v1974_v21  ;;  %v4151_v21 = vld [vmem:[#allocation30_spill] sm:$0xff]  ;;  %v2630_v47 = vld [vmem:[%s4069_s3 + $0x68] sm:$0xf0] }
 0x1cd   :  { %2065 = vmatpush.bf16.msra.mxu2 %v1968_v11 }
 0x1ce   :  { %v849_v16 = vpop.f32.mrf.mxu0 }
 0x1cf   :  { %2087 = vmatmul.bf16.vlgmr.msra.gmra.mxu3 %v2585_v0  ;;  %v850_v8 = vadd.f32 %v849_v16, %v4148_v30  ;;  %v4152_v0 = vld [vmem:[#allocation8_spill] sm:$0xff]  ;;  %v2671_v16 = vld [vmem:[%s4069_s3 + $0x4c] sm:$0xf] }
 0x1d0   :  { %2157 = vmatpush.bf16.msrb.mxu3 %v988_v58  ;;  %v847_v58 = vadd.f32 %v846_v26, %v4150_v14  ;;  %v845_v11 = vadd.f32 %v844_v10, %v4152_v0 }
 0x1d1   :  { %2066 = vmatpush.bf16.msra.mxu2 %v1967_v32  ;;  %v949_v25 = vmax.f32 %v850_v8, 0.0 }
 0x1d2   :  { %v947_v56 = vmax.f32 %v845_v11, 0.0 }
 0x1d4   :  { %2158 = vmatpush.bf16.msrb.mxu3 %v987_v54  ;;  %v948_v54 = vmax.f32 %v847_v58, 0.0 }
 0x1d5   :  { %2067 = vmatpush.bf16.msra.mxu2 %v1966_v53  ;;  %v4157_v53 = vld [vmem:[#allocation6_spill] sm:$0xff] }
 0x1d6   :  { %v851_v55 = vpop.f32.mrf.mxu0  ;;  %v837_v10 = vadd.f32 %v3918_v4, %v4157_v53 }
 0x1d7   :  { %v852_v44 = vadd.f32 %v851_v55, %v4146_v5 }
 0x1d8   :  { %2159 = vmatpush.bf16.msrb.mxu3 %v3787_v60  ;;  %2068 = vmatmul.bf16.vlgmr.msra.gmra.mxu2 %v2581_v37  ;;  %v4133_v60 = vld [vmem:[#allocation20_spill] sm:$0xff]  ;;  %v946_v37 = vmax.f32 %v842_v46, 0.0  ;;  %v944_v26 = vmax.f32 %v837_v10, 0.0 }
 0x1d9   :  { %2138 = vmatpush.bf16.msrb.mxu2 %v4130_v13  ;;  %v950_v59 = vmax.f32 %v852_v44, 0.0  ;;  %v992_v13 = vpack.c.bf16 %v948_v54, %v947_v56 }
 0x1db   :  { %v993_v32 = vpack.c.bf16 %v950_v59, %v949_v25 }
 0x1dc   :  { %2160 = vmatpush.bf16.msrb.mxu3 %v3752_v62  ;;  %v4135_v62 = vld [vmem:[#allocation17_spill] sm:$0xff] }
 0x1dd   :  { %2139 = vmatpush.bf16.msrb.mxu2 %v4131_v24  ;;  %v4159_v24 = vld [vmem:[#allocation14_spill] sm:$0xff] }
 0x1de   :  { %v835_v43 = vadd.f32 %v3906_v63, %v4159_v24  ;;  %v2617_v63 = vor.u32 %v2667_v36, %v2614_v38 }
 0x1df   :  { %2092 = vmatmul.bf16.gmra.mxu3 %v2601_v17  ;;  %v945_v17 = vmax.f32 %v840_v7, 0.0 }
 0x1e0   :  { %2161 = vmatpush.bf16.msrb.mxu3 %v4132_v12  ;;  %v2621_v12 = vor.u32 %v2672_v6, %v2620_v33 }
 0x1e1   :  { %2140 = vmatpush.bf16.msrb.mxu2 %v4133_v60  ;;  %v991_v4 = vpack.c.bf16 %v946_v37, %v945_v17  ;;  %v4160_v60 = vld [vmem:[#allocation25_spill] sm:$0xff] }
 0x1e4   :  { %2162 = vmatpush.bf16.msrb.mxu3 %v4134_v31  ;;  %v943_v31 = vmax.f32 %v835_v43, 0.0 }
 0x1e5   :  { %2141 = vmatpush.bf16.msrb.mxu2 %v4135_v62 }
 0x1e6   :  { %v990_v62 = vpack.c.bf16 %v944_v26, %v943_v31 }
 0x1e8   :  { %2163 = vmatpush.bf16.msrb.mxu3 %v4136_v40  ;;  %2073 = vmatmul.bf16.gmra.mxu2 %v2597_v52  ;;  %v2612_v52 = vld [vmem:[%s4069_s3 + $0x8] sm:$0xf] }
 0x1e9   :  { %2142 = vmatpush.bf16.msrb.mxu2 %v4137_v28  ;;  %v2669_v40 = vld [vmem:[%s4069_s3 + $0x24] sm:$0xf0] }
 0x1ea   :  { %v2613_v28 = vor.u32 %v2669_v40, %v2612_v52 }
 0x1ec   :  { %2164 = vmatpush.bf16.msrb.mxu3 %v4138_v20  ;;  %v2673_v20 = vld [vmem:[%s4069_s3 + $0x64] sm:$0xf0] }
 0x1ed   :  { %2143 = vmatpush.bf16.msrb.mxu2 %v4139_v48 }
 0x1ef   :  { %2165 = vmatmul.bf16.vlgmr.msrb.gmra.mxu3 %v2609_v22 }
 0x1f0   :  { %2195 = vmatpush.bf16.msra.mxu3 %v4140_v19  ;;  %v2629_v19 = vor.u32 %v2673_v20, %v2628_v49 }
 0x1f1   :  { %2144 = vmatpush.bf16.msrb.mxu2 %v4141_v51 }
 0x1f4   :  { %2196 = vmatpush.bf16.msra.mxu3 %v4142_v2 }
 0x1f5   :  { %2145 = vmatpush.bf16.msrb.mxu2 %v4143_v34 }
 0x1f8   :  { %2197 = vmatpush.bf16.msra.mxu3 %v4144_v50  ;;  %2146 = vmatmul.bf16.vlgmr.msrb.gmra.mxu2 %v2605_v42 }
 0x1f9   :  { %2176 = vmatpush.bf16.msra.mxu2 %v4145_v35 }
 0x1fc   :  { %2198 = vmatpush.bf16.msra.mxu3 %v4147_v23 }
 0x1fd   :  { %2177 = vmatpush.bf16.msra.mxu2 %v4149_v1 }
 0x1ff   :  { %2170 = vmatmul.bf16.gmra.mxu3 %v2625_v57 }
 0x200   :  { %2199 = vmatpush.bf16.msra.mxu3 %v4151_v21 }
 0x201   :  { %2178 = vmatpush.bf16.msra.mxu2 %v4153_v45 }
 0x203   :  { %v2031_v48 = vpop.f32.mrf.mxu2 }
 0x204   :  { %2200 = vmatpush.bf16.msra.mxu3 %v4155_v27 }
 0x205   :  { %2179 = vmatpush.bf16.msra.mxu2 %v993_v32 }
 0x208   :  { %2201 = vmatpush.bf16.msra.mxu3 %v4158_v9  ;;  %2151 = vmatmul.bf16.gmra.mxu2 %v2621_v12 }
 0x209   :  { %2180 = vmatpush.bf16.msra.mxu2 %v992_v13  ;;  %v2221_v13 = vpop.permute.xlu2 %2220 }
 0x20b   :  { %v2033_v2 = vpop.f32.mrf.mxu2 }
 0x20c   :  { %2202 = vmatpush.bf16.msra.mxu3 %v4160_v60  ;;  %v2226_v60 = vpop.permute.xlu0 %2225 }
 0x20d   :  { %2181 = vmatpush.bf16.msra.mxu2 %v991_v4 }
 0x20f   :  { %2203 = vmatmul.bf16.vlgmr.msra.gmra.mxu3 %v2617_v63 }
 0x211   :  { %2182 = vmatpush.bf16.msra.mxu2 %v990_v62 }
 0x215   :  { %2183 = vmatpush.bf16.msra.mxu2 %v3857_v3  ;;  %v2633_v3 = vor.u32 %v2671_v16, %v2630_v47  ;;  %v2231_v47 = vpop.permute.xlu1 %2230 }
 0x218   :  { %2184 = vmatmul.bf16.vlgmr.msra.gmra.mxu2 %v2613_v28 }
 0x21c   :  { %v2036_v55 = vpop.f32.mrf.mxu2 }
 0x21f   :  { %2208 = vmatmul.bf16.gmra.mxu3 %v2633_v3 }
 0x224   :  { %v2038_v35 = vpop.f32.mrf.mxu2 }
 0x228   :  { %2189 = vmatmul.bf16.gmra.mxu2 %v2629_v19 }
 0x22b   :  { %v2050_v22 = vpop.f32.mrf.mxu3 }
 0x22c   :  { %v2051_v51 = vadd.f32 %v2050_v22, %v2031_v48 }
 0x233   :  { %v2052_v61 = vpop.f32.mrf.mxu3 }
 0x234   :  { %v2053_v39 = vadd.f32 %v2052_v61, %v2033_v2 }
 0x23b   :  { %v2055_v34 = vpop.f32.mrf.mxu3 }
 0x23c   :  { %v2056_v50 = vadd.f32 %v2055_v34, %v2036_v55 }
 0x243   :  { %v2057_v42 = vpop.f32.mrf.mxu3 }
 0x244   :  { %v2058_v5 = vadd.f32 %v2057_v42, %v2038_v35 }
 0x252   :  { %v2088_v44 = vpop.f32.mrf.mxu3 }
 0x25a   :  { %v2090_v23 = vpop.f32.mrf.mxu3 }
 0x25b   :  { %v2069_v30 = vpop.f32.mrf.mxu2 }
 0x25c   :  { %v2070_v57 = vadd.f32 %v2069_v30, %v2051_v51  ;;  %v2236_v51 = vpop.permute.xlu2 %2235 }
 0x25e   :  { %v2089_v46 = vadd.f32 %v2088_v44, %v2070_v57 }
 0x262   :  { %v2093_v8 = vpop.f32.mrf.mxu3 }
 0x263   :  { %v2071_v1 = vpop.f32.mrf.mxu2 }
 0x264   :  { %v2072_v27 = vadd.f32 %v2071_v1, %v2053_v39 }
 0x266   :  { %v2091_v56 = vadd.f32 %v2090_v23, %v2072_v27 }
 0x26a   :  { %v2095_v29 = vpop.f32.mrf.mxu3 }
 0x26b   :  { %v2074_v41 = vpop.f32.mrf.mxu2 }
 0x26c   :  { %v2075_v33 = vadd.f32 %v2074_v41, %v2056_v50 }
 0x26e   :  { %v2094_v17 = vadd.f32 %v2093_v8, %v2075_v33 }
 0x272   :  { %v2166_v14 = vpop.f32.mrf.mxu3 }
 0x273   :  { %v2076_v58 = vpop.f32.mrf.mxu2 }
 0x274   :  { %v2077_v31 = vadd.f32 %v2076_v58, %v2058_v5 }
 0x276   :  { %v2096_v52 = vadd.f32 %v2095_v29, %v2077_v31 }
 0x27a   :  { %v2168_v59 = vpop.f32.mrf.mxu3 }
 0x27b   :  { %v2147_v21 = vpop.f32.mrf.mxu2 }
 0x27c   :  { %v2148_v54 = vadd.f32 %v2147_v21, %v2089_v46 }
 0x27e   :  { %v2167_v18 = vadd.f32 %v2166_v14, %v2148_v54 }
 0x282   :  { %v2171_v11 = vpop.f32.mrf.mxu3 }
 0x283   :  { %v2149_v0 = vpop.f32.mrf.mxu2 }
 0x284   :  { %v2150_v10 = vadd.f32 %v2149_v0, %v2091_v56 }
 0x286   :  { %v2169_v24 = vadd.f32 %v2168_v59, %v2150_v10 }
 0x28a   :  { %v2173_v45 = vpop.f32.mrf.mxu3 }
 0x28b   :  { %v2152_v25 = vpop.f32.mrf.mxu2 }
 0x28c   :  { %v2153_v26 = vadd.f32 %v2152_v25, %v2094_v17 }
 0x28e   :  { %v2172_v38 = vadd.f32 %v2171_v11, %v2153_v26 }
 0x292   :  { %v2204_v32 = vpop.f32.mrf.mxu3 }
 0x293   :  { %v2154_v15 = vpop.f32.mrf.mxu2 }
 0x294   :  { %v2155_v28 = vadd.f32 %v2154_v15, %v2096_v52 }
 0x296   :  { %v2174_v49 = vadd.f32 %v2173_v45, %v2155_v28 }
 0x29a   :  { %v2206_v9 = vpop.f32.mrf.mxu3 }
 0x29b   :  { %v2185_v7 = vpop.f32.mrf.mxu2 }
 0x29c   :  { %v2186_v53 = vadd.f32 %v2185_v7, %v2167_v18 }
 0x29e   :  { %v2205_v37 = vadd.f32 %v2204_v32, %v2186_v53 }
 0x2a0   :  { %v2238_v6 = vadd.f32 %v2221_v13, %v2205_v37 }
 0x2a2   :  { %2242 = vst [vmem:[%s4070_s5] sm:$0xff] %v2238_v6  ;;  %v2209_v63 = vpop.f32.mrf.mxu3 }
 0x2a3   :  { %v2187_v43 = vpop.f32.mrf.mxu2 }
 0x2a4   :  { %v2188_v12 = vadd.f32 %v2187_v43, %v2169_v24 }
 0x2a6   :  { %v2207_v4 = vadd.f32 %v2206_v9, %v2188_v12 }
 0x2a8   :  { %v2239_v36 = vadd.f32 %v2226_v60, %v2207_v4 }
 0x2aa   :  { %2243 = vst [vmem:[%s4070_s5 + $0x8] sm:$0xff] %v2239_v36  ;;  %v2211_v19 = vpop.f32.mrf.mxu3 }
 0x2ab   :  { %v2190_v62 = vpop.f32.mrf.mxu2 }
 0x2ac   :  { %v2191_v40 = vadd.f32 %v2190_v62, %v2172_v38 }
 0x2ae   :  { %v2210_v16 = vadd.f32 %v2209_v63, %v2191_v40 }
 0x2b0   :  { %v2240_v3 = vadd.f32 %v2231_v47, %v2210_v16 }
 0x2b2   :  { %2244 = vst [vmem:[%s4070_s5 + $0x10] sm:$0xff] %v2240_v3 }
 0x2b3   :  { %v2192_v20 = vpop.f32.mrf.mxu2 }
 0x2b4   :  { %v2193_v48 = vadd.f32 %v2192_v20, %v2174_v49 }
 0x2b6   :  { %v2212_v22 = vadd.f32 %v2211_v19, %v2193_v48 }
 0x2b8   :  { %v2241_v2 = vadd.f32 %v2236_v51, %v2212_v22 }
 0x2ba   :  { %2245 = vst [vmem:[%s4070_s5 + $0x18] sm:$0xff] %v2241_v2 }

</bundles_post_ra>
